<compile_context>
chip_gen: v5e
topology: v5e:2x2
jax: 0.10.0
libtpu: 0.0.40
codegen_flags: <defaults>
</compile_context>

<pallas_src>
import jax
import jax.numpy as jnp
from jax.experimental import pallas as pl
from jax.experimental.pallas import tpu as pltpu


def _round_up(x, m):
    return ((x + m - 1) // m) * m


def _make_fused_kernel(N, H, W, P, eps):
    """Fused 1x1-conv + BN(batch stats) + ReLU + 3x3-conv kernel.

    Assumes the whole working set fits in VMEM (true for DenseNet-style
    1x7x7 / small-N feature maps; ~1 MB at the spec shape).
    """
    HW = H * W
    Wp = _round_up(W + 2, 8)          # aligned row pitch of the halo slab
    PRE = 8                            # zero prefix -> all tap offsets >= 0,
                                       # row-store offsets stay multiples of 8
    SLAB = PRE + (H + 2) * Wp          # flattened padded-slab rows
    L = (H - 1) * Wp + W               # padded-grid conv rows actually needed
    inv_p = 1.0 / float(P)
    eps_f = float(eps)

    def kernel(x_ref, w1_ref, gamma_ref, beta_ref, w2_ref, o_ref,
               act_ref, slab_ref, cols_ref):
        # x_ref:     (P, Cin)        bf16   NHWC-flattened input
        # w1_ref:    (Cin, Cmid)     bf16   1x1 conv weights
        # gamma_ref: (1, Cmid)       f32
        # beta_ref:  (1, Cmid)       f32
        # w2_ref:    (9*Cmid, CoutP) bf16   3x3 weights, taps stacked along K
        # o_ref:     (N, H*Wp, CoutP) f32   padded-grid conv output (cropped in wrapper)
        # act_ref:   (P, Cmid)       f32    scratch: normalized+ReLU activations
        # slab_ref:  (SLAB, Cmid)    f32    scratch: zero-padded halo slab (one image)
        # cols_ref:  (L, 9*Cmid)     bf16   scratch: stacked-K im2col
        Cmid = w1_ref.shape[1]

        # ---- 1x1 conv (MXU, bf16 x bf16 -> f32) + batch statistics ----
        y = jnp.dot(x_ref[...], w1_ref[...], preferred_element_type=jnp.float32)
        ch_sum = jnp.sum(y, axis=0, keepdims=True)
        ch_ssq = jnp.sum(y * y, axis=0, keepdims=True)

        # ---- BatchNorm fold (training-mode batch mean, biased variance) ----
        mean = ch_sum * inv_p
        var = jnp.maximum(ch_ssq * inv_p - mean * mean, 0.0)
        scale = gamma_ref[...] * jax.lax.rsqrt(var + eps_f)     # EUP rsqrt
        shift = beta_ref[...] - mean * scale

        # ---- BN apply + ReLU (VPU), all rows at once ----
        act_ref[...] = jnp.maximum(y * scale + shift, 0.0)

        # Halo/tail cells of the slab are written once and never touched again
        # (each image overwrites exactly the same interior cells).
        slab_ref[...] = jnp.zeros_like(slab_ref)

        # ---- per-image 3x3 conv: aligned slab scatter -> stacked-K im2col ->
        #      single MXU matmul (K = 9*Cmid fills the 256-deep MXU) ----
        for n in range(N):
            base = n * HW
            for i in range(H):
                dst = PRE + (i + 1) * Wp            # multiple of 8 -> aligned store
                slab_ref[dst:dst + W, :] = act_ref[base + i * W: base + (i + 1) * W, :]

            for ky in range(3):
                for kx in range(3):
                    t = ky * 3 + kx
                    src = PRE - 1 + ky * Wp + kx    # shifted contiguous view
                    cols_ref[:, t * Cmid:(t + 1) * Cmid] = (
                        slab_ref[src:src + L, :].astype(jnp.bfloat16))

            acc = jnp.dot(cols_ref[...], w2_ref[...],
                          preferred_element_type=jnp.float32)
            o_ref[n, :L, :] = acc

    return kernel, Wp, L, SLAB


def forward(x_nchw, w1, gamma, beta, w2, *, eps=1e-5):
    """
    x_nchw: (N, 544, H, W) f32
    w1:     (128, 544, 1, 1)   PyTorch conv weight layout
    gamma, beta: (128,)
    w2:     (32, 128, 3, 3)
    returns (N, 32, H, W) f32
    """
    N, Cin, H, W = x_nchw.shape
    Cmid = w1.shape[0]
    Cout = w2.shape[0]
    HW = H * W
    P = N * HW
    CoutP = _round_up(Cout, 128)        # lane-dense output, cropped in wrapper

    kernel, Wp, L, SLAB = _make_fused_kernel(N, H, W, P, eps)
    HWp = H * Wp

    # --- glue (weight prep + NHWC flatten); constant-foldable in a real graph ---
    x_flat = jnp.transpose(x_nchw, (0, 2, 3, 1)).reshape(P, Cin).astype(jnp.bfloat16)
    w1_mat = jnp.transpose(w1.reshape(Cmid, Cin), (1, 0)).astype(jnp.bfloat16)
    w2_mat = jnp.transpose(w2, (2, 3, 1, 0)).reshape(9 * Cmid, Cout)
    w2_mat = jnp.pad(w2_mat, ((0, 0), (0, CoutP - Cout))).astype(jnp.bfloat16)
    gamma2 = gamma.reshape(1, Cmid).astype(jnp.float32)
    beta2 = beta.reshape(1, Cmid).astype(jnp.float32)

    cost = pl.CostEstimate(
        flops=2 * P * Cin * Cmid + 2 * N * L * 9 * Cmid * CoutP,
        transcendentals=Cmid,
        bytes_accessed=(P * Cin * 2 + Cin * Cmid * 2 + 9 * Cmid * CoutP * 2
                        + 4 * Cmid * 4 + N * HWp * CoutP * 4),
    )

    out_pad = pl.pallas_call(
        kernel,
        grid=(1,),
        in_specs=[
            pl.BlockSpec((P, Cin), lambda i: (0, 0)),
            pl.BlockSpec((Cin, Cmid), lambda i: (0, 0)),
            pl.BlockSpec((1, Cmid), lambda i: (0, 0)),
            pl.BlockSpec((1, Cmid), lambda i: (0, 0)),
            pl.BlockSpec((9 * Cmid, CoutP), lambda i: (0, 0)),
        ],
        out_specs=pl.BlockSpec((N, HWp, CoutP), lambda i: (0, 0, 0)),
        out_shape=jax.ShapeDtypeStruct((N, HWp, CoutP), jnp.float32),
        scratch_shapes=[
            pltpu.VMEM((P, Cmid), jnp.float32),        # normalized activations
            pltpu.VMEM((SLAB, Cmid), jnp.float32),     # halo slab (aligned pitch)
            pltpu.VMEM((L, 9 * Cmid), jnp.bfloat16),   # stacked-K im2col
        ],
        compiler_params=pltpu.CompilerParams(
            dimension_semantics=("arbitrary",)),
        cost_estimate=cost,
    )(x_flat, w1_mat, gamma2, beta2, w2_mat)

    # --- crop halo columns + channel padding, back to NCHW ---
    # reshape is a contiguous-dim split (bitcast); one slice + one transpose.
    out = out_pad.reshape(N, H, Wp, CoutP)[:, :, :W, :Cout]
    return jnp.transpose(out, (0, 3, 1, 2))


if __name__ == "__main__":
    key = jax.random.PRNGKey(0)
    k_x, k_w1, k_w2, k_g, k_b = jax.random.split(key, 5)

    N, Cin, H, W = 1, 544, 7, 7
    Cmid, Cout = 128, 32

    x = jax.random.normal(k_x, (N, Cin, H, W), dtype=jnp.float32)
    w1 = jax.random.normal(k_w1, (Cmid, Cin, 1, 1), dtype=jnp.float32) * 0.05
    w2 = jax.random.normal(k_w2, (Cout, Cmid, 3, 3), dtype=jnp.float32) * 0.05
    gamma = 1.0 + 0.1 * jax.random.normal(k_g, (Cmid,), dtype=jnp.float32)
    beta = 0.1 * jax.random.normal(k_b, (Cmid,), dtype=jnp.float32)

    out = jax.jit(forward)(x, w1, gamma, beta, w2)
    out = jax.block_until_ready(out)

    assert out.shape == (N, Cout, H, W), out.shape
    assert bool(jnp.all(jnp.isfinite(out)))
    print("KERNEL_OK")
</pallas_src>

<mosaic_0001>
module attributes {stable_mosaic.version = 11 : i64} {
  func.func @kernel(%arg0: i32, %arg1: memref<49x544xbf16, #tpu.memory_space<vmem>>, %arg2: memref<544x128xbf16, #tpu.memory_space<vmem>>, %arg3: memref<1x128xf32, #tpu.memory_space<vmem>>, %arg4: memref<1x128xf32, #tpu.memory_space<vmem>>, %arg5: memref<1152x128xbf16, #tpu.memory_space<vmem>>, %arg6: memref<1x112x128xf32, #tpu.memory_space<vmem>>, %arg7: memref<49x128xf32, #tpu.memory_space<vmem>>, %arg8: memref<152x128xf32, #tpu.memory_space<vmem>>, %arg9: memref<103x1152xbf16, #tpu.memory_space<vmem>>) attributes {dimension_semantics = [#tpu.dimension_semantics<arbitrary>], iteration_bounds = array<i64: 1>, scalar_prefetch = 0 : i64, scratch_operands = 3 : i64, tpu.core_type = #tpu.core_type<tc>, window_params = [{pipeline_mode = #tpu.pipeline_mode<synchronous>, transform_indices = @transform_0, window_bounds = array<i64: 49, 544>}, {pipeline_mode = #tpu.pipeline_mode<synchronous>, transform_indices = @transform_1, window_bounds = array<i64: 544, 128>}, {pipeline_mode = #tpu.pipeline_mode<synchronous>, transform_indices = @transform_2, window_bounds = array<i64: 1, 128>}, {pipeline_mode = #tpu.pipeline_mode<synchronous>, transform_indices = @transform_3, window_bounds = array<i64: 1, 128>}, {pipeline_mode = #tpu.pipeline_mode<synchronous>, transform_indices = @transform_4, window_bounds = array<i64: 1152, 128>}, {pipeline_mode = #tpu.pipeline_mode<synchronous>, transform_indices = @transform_5, window_bounds = array<i64: 1, 112, 128>}]} {
    %c0 = arith.constant 0 : index
    %c0_0 = arith.constant 0 : index
    %0 = vector.load %arg1[%c0, %c0_0] : memref<49x544xbf16, #tpu.memory_space<vmem>>, vector<49x544xbf16>
    %c0_1 = arith.constant 0 : index
    %c0_2 = arith.constant 0 : index
    %1 = vector.load %arg2[%c0_1, %c0_2] : memref<544x128xbf16, #tpu.memory_space<vmem>>, vector<544x128xbf16>
    %cst = arith.constant dense<0.000000e+00> : vector<49x128xf32>
    %2 = tpu.matmul %0, %1, %cst {dimension_numbers = #tpu.dot_dimension_numbers<[1], [0], [0], [1], [0, 0, 1, 1], [], []>} : vector<49x544xbf16>, vector<544x128xbf16>, vector<49x128xf32> -> vector<49x128xf32>
    %cst_3 = arith.constant dense<0.000000e+00> : vector<128xf32>
    %3 = vector.multi_reduction <add>, %2, %cst_3 [0] : vector<49x128xf32> to vector<128xf32>
    %4 = vector.shape_cast %3 : vector<128xf32> to vector<1x128xf32>
    %5 = arith.mulf %2, %2 : vector<49x128xf32>
    %cst_4 = arith.constant dense<0.000000e+00> : vector<128xf32>
    %6 = vector.multi_reduction <add>, %5, %cst_4 [0] : vector<49x128xf32> to vector<128xf32>
    %7 = vector.shape_cast %6 : vector<128xf32> to vector<1x128xf32>
    %cst_5 = arith.constant 0.0204081628 : f32
    %8 = vector.broadcast %cst_5 : f32 to vector<1x128xf32>
    %9 = arith.mulf %4, %8 : vector<1x128xf32>
    %cst_6 = arith.constant 0.0204081628 : f32
    %10 = vector.broadcast %cst_6 : f32 to vector<1x128xf32>
    %11 = arith.mulf %7, %10 : vector<1x128xf32>
    %12 = arith.mulf %9, %9 : vector<1x128xf32>
    %13 = arith.subf %11, %12 : vector<1x128xf32>
    %cst_7 = arith.constant 0.000000e+00 : f32
    %14 = vector.broadcast %cst_7 : f32 to vector<1x128xf32>
    %15 = arith.maximumf %13, %14 : vector<1x128xf32>
    %c0_8 = arith.constant 0 : index
    %c0_9 = arith.constant 0 : index
    %16 = vector.load %arg3[%c0_8, %c0_9] : memref<1x128xf32, #tpu.memory_space<vmem>>, vector<1x128xf32>
    %cst_10 = arith.constant 9.99999974E-6 : f32
    %17 = vector.broadcast %cst_10 : f32 to vector<1x128xf32>
    %18 = arith.addf %15, %17 : vector<1x128xf32>
    %19 = math.rsqrt %18 : vector<1x128xf32>
    %20 = arith.mulf %16, %19 : vector<1x128xf32>
    %c0_11 = arith.constant 0 : index
    %c0_12 = arith.constant 0 : index
    %21 = vector.load %arg4[%c0_11, %c0_12] : memref<1x128xf32, #tpu.memory_space<vmem>>, vector<1x128xf32>
    %22 = arith.mulf %9, %20 : vector<1x128xf32>
    %23 = arith.subf %21, %22 : vector<1x128xf32>
    %24 = vector.broadcast %20 : vector<1x128xf32> to vector<49x128xf32>
    %25 = arith.mulf %2, %24 : vector<49x128xf32>
    %26 = vector.broadcast %23 : vector<1x128xf32> to vector<49x128xf32>
    %27 = arith.addf %25, %26 : vector<49x128xf32>
    %cst_13 = arith.constant 0.000000e+00 : f32
    %28 = vector.broadcast %cst_13 : f32 to vector<49x128xf32>
    %29 = arith.maximumf %27, %28 : vector<49x128xf32>
    %c0_14 = arith.constant 0 : index
    %c0_15 = arith.constant 0 : index
    %30 = vector.load %arg7[%c0_14, %c0_15] : memref<49x128xf32, #tpu.memory_space<vmem>>, vector<49x128xf32>
    tpu.vector_store %arg7[%c0_14, %c0_15], %29 {strides = array<i32>} : memref<49x128xf32, #tpu.memory_space<vmem>>, vector<49x128xf32>,
    %cst_16 = arith.constant 0.000000e+00 : f32
    %31 = vector.broadcast %cst_16 : f32 to vector<152x128xf32>
    %c0_17 = arith.constant 0 : index
    %c0_18 = arith.constant 0 : index
    %32 = vector.load %arg8[%c0_17, %c0_18] : memref<152x128xf32, #tpu.memory_space<vmem>>, vector<152x128xf32>
    tpu.vector_store %arg8[%c0_17, %c0_18], %31 {strides = array<i32>} : memref<152x128xf32, #tpu.memory_space<vmem>>, vector<152x128xf32>,
    %c0_19 = arith.constant 0 : index
    %c0_20 = arith.constant 0 : index
    %33 = vector.load %arg7[%c0_19, %c0_20] : memref<49x128xf32, #tpu.memory_space<vmem>>, vector<7x128xf32>
    %c24 = arith.constant 24 : index
    %c0_21 = arith.constant 0 : index
    %34 = vector.load %arg8[%c24, %c0_21] : memref<152x128xf32, #tpu.memory_space<vmem>>, vector<7x128xf32>
    tpu.vector_store %arg8[%c24, %c0_21], %33 {strides = array<i32>} : memref<152x128xf32, #tpu.memory_space<vmem>>, vector<7x128xf32>,
    %c7 = arith.constant 7 : index
    %c0_22 = arith.constant 0 : index
    %35 = vector.load %arg7[%c7, %c0_22] : memref<49x128xf32, #tpu.memory_space<vmem>>, vector<7x128xf32>
    %c40 = arith.constant 40 : index
    %c0_23 = arith.constant 0 : index
    %36 = vector.load %arg8[%c40, %c0_23] : memref<152x128xf32, #tpu.memory_space<vmem>>, vector<7x128xf32>
    tpu.vector_store %arg8[%c40, %c0_23], %35 {strides = array<i32>} : memref<152x128xf32, #tpu.memory_space<vmem>>, vector<7x128xf32>,
    %c14 = arith.constant 14 : index
    %c0_24 = arith.constant 0 : index
    %37 = vector.load %arg7[%c14, %c0_24] : memref<49x128xf32, #tpu.memory_space<vmem>>, vector<7x128xf32>
    %c56 = arith.constant 56 : index
    %c0_25 = arith.constant 0 : index
    %38 = vector.load %arg8[%c56, %c0_25] : memref<152x128xf32, #tpu.memory_space<vmem>>, vector<7x128xf32>
    tpu.vector_store %arg8[%c56, %c0_25], %37 {strides = array<i32>} : memref<152x128xf32, #tpu.memory_space<vmem>>, vector<7x128xf32>,
    %c21 = arith.constant 21 : index
    %c0_26 = arith.constant 0 : index
    %39 = vector.load %arg7[%c21, %c0_26] : memref<49x128xf32, #tpu.memory_space<vmem>>, vector<7x128xf32>
    %c72 = arith.constant 72 : index
    %c0_27 = arith.constant 0 : index
    %40 = vector.load %arg8[%c72, %c0_27] : memref<152x128xf32, #tpu.memory_space<vmem>>, vector<7x128xf32>
    tpu.vector_store %arg8[%c72, %c0_27], %39 {strides = array<i32>} : memref<152x128xf32, #tpu.memory_space<vmem>>, vector<7x128xf32>,
    %c28 = arith.constant 28 : index
    %c0_28 = arith.constant 0 : index
    %41 = vector.load %arg7[%c28, %c0_28] : memref<49x128xf32, #tpu.memory_space<vmem>>, vector<7x128xf32>
    %c88 = arith.constant 88 : index
    %c0_29 = arith.constant 0 : index
    %42 = vector.load %arg8[%c88, %c0_29] : memref<152x128xf32, #tpu.memory_space<vmem>>, vector<7x128xf32>
    tpu.vector_store %arg8[%c88, %c0_29], %41 {strides = array<i32>} : memref<152x128xf32, #tpu.memory_space<vmem>>, vector<7x128xf32>,
    %c35 = arith.constant 35 : index
    %c0_30 = arith.constant 0 : index
    %43 = vector.load %arg7[%c35, %c0_30] : memref<49x128xf32, #tpu.memory_space<vmem>>, vector<7x128xf32>
    %c104 = arith.constant 104 : index
    %c0_31 = arith.constant 0 : index
    %44 = vector.load %arg8[%c104, %c0_31] : memref<152x128xf32, #tpu.memory_space<vmem>>, vector<7x128xf32>
    tpu.vector_store %arg8[%c104, %c0_31], %43 {strides = array<i32>} : memref<152x128xf32, #tpu.memory_space<vmem>>, vector<7x128xf32>,
    %c42 = arith.constant 42 : index
    %c0_32 = arith.constant 0 : index
    %45 = vector.load %arg7[%c42, %c0_32] : memref<49x128xf32, #tpu.memory_space<vmem>>, vector<7x128xf32>
    %c120 = arith.constant 120 : index
    %c0_33 = arith.constant 0 : index
    %46 = vector.load %arg8[%c120, %c0_33] : memref<152x128xf32, #tpu.memory_space<vmem>>, vector<7x128xf32>
    tpu.vector_store %arg8[%c120, %c0_33], %45 {strides = array<i32>} : memref<152x128xf32, #tpu.memory_space<vmem>>, vector<7x128xf32>,
    %c7_34 = arith.constant 7 : index
    %c0_35 = arith.constant 0 : index
    %47 = vector.load %arg8[%c7_34, %c0_35] : memref<152x128xf32, #tpu.memory_space<vmem>>, vector<103x128xf32>
    %48 = arith.truncf %47 : vector<103x128xf32> to vector<103x128xbf16>
    %c0_36 = arith.constant 0 : index
    %c0_37 = arith.constant 0 : index
    %49 = vector.load %arg9[%c0_36, %c0_37] : memref<103x1152xbf16, #tpu.memory_space<vmem>>, vector<103x128xbf16>
    tpu.vector_store %arg9[%c0_36, %c0_37], %48 {strides = array<i32>} : memref<103x1152xbf16, #tpu.memory_space<vmem>>, vector<103x128xbf16>,
    %c8 = arith.constant 8 : index
    %c0_38 = arith.constant 0 : index
    %50 = vector.load %arg8[%c8, %c0_38] : memref<152x128xf32, #tpu.memory_space<vmem>>, vector<103x128xf32>
    %51 = arith.truncf %50 : vector<103x128xf32> to vector<103x128xbf16>
    %c0_39 = arith.constant 0 : index
    %c128 = arith.constant 128 : index
    %52 = vector.load %arg9[%c0_39, %c128] : memref<103x1152xbf16, #tpu.memory_space<vmem>>, vector<103x128xbf16>
    tpu.vector_store %arg9[%c0_39, %c128], %51 {strides = array<i32>} : memref<103x1152xbf16, #tpu.memory_space<vmem>>, vector<103x128xbf16>,
    %c9 = arith.constant 9 : index
    %c0_40 = arith.constant 0 : index
    %53 = vector.load %arg8[%c9, %c0_40] : memref<152x128xf32, #tpu.memory_space<vmem>>, vector<103x128xf32>
    %54 = arith.truncf %53 : vector<103x128xf32> to vector<103x128xbf16>
    %c0_41 = arith.constant 0 : index
    %c256 = arith.constant 256 : index
    %55 = vector.load %arg9[%c0_41, %c256] : memref<103x1152xbf16, #tpu.memory_space<vmem>>, vector<103x128xbf16>
    tpu.vector_store %arg9[%c0_41, %c256], %54 {strides = array<i32>} : memref<103x1152xbf16, #tpu.memory_space<vmem>>, vector<103x128xbf16>,
    %c23 = arith.constant 23 : index
    %c0_42 = arith.constant 0 : index
    %56 = vector.load %arg8[%c23, %c0_42] : memref<152x128xf32, #tpu.memory_space<vmem>>, vector<103x128xf32>
    %57 = arith.truncf %56 : vector<103x128xf32> to vector<103x128xbf16>
    %c0_43 = arith.constant 0 : index
    %c384 = arith.constant 384 : index
    %58 = vector.load %arg9[%c0_43, %c384] : memref<103x1152xbf16, #tpu.memory_space<vmem>>, vector<103x128xbf16>
    tpu.vector_store %arg9[%c0_43, %c384], %57 {strides = array<i32>} : memref<103x1152xbf16, #tpu.memory_space<vmem>>, vector<103x128xbf16>,
    %c24_44 = arith.constant 24 : index
    %c0_45 = arith.constant 0 : index
    %59 = vector.load %arg8[%c24_44, %c0_45] : memref<152x128xf32, #tpu.memory_space<vmem>>, vector<103x128xf32>
    %60 = arith.truncf %59 : vector<103x128xf32> to vector<103x128xbf16>
    %c0_46 = arith.constant 0 : index
    %c512 = arith.constant 512 : index
    %61 = vector.load %arg9[%c0_46, %c512] : memref<103x1152xbf16, #tpu.memory_space<vmem>>, vector<103x128xbf16>
    tpu.vector_store %arg9[%c0_46, %c512], %60 {strides = array<i32>} : memref<103x1152xbf16, #tpu.memory_space<vmem>>, vector<103x128xbf16>,
    %c25 = arith.constant 25 : index
    %c0_47 = arith.constant 0 : index
    %62 = vector.load %arg8[%c25, %c0_47] : memref<152x128xf32, #tpu.memory_space<vmem>>, vector<103x128xf32>
    %63 = arith.truncf %62 : vector<103x128xf32> to vector<103x128xbf16>
    %c0_48 = arith.constant 0 : index
    %c640 = arith.constant 640 : index
    %64 = vector.load %arg9[%c0_48, %c640] : memref<103x1152xbf16, #tpu.memory_space<vmem>>, vector<103x128xbf16>
    tpu.vector_store %arg9[%c0_48, %c640], %63 {strides = array<i32>} : memref<103x1152xbf16, #tpu.memory_space<vmem>>, vector<103x128xbf16>,
    %c39 = arith.constant 39 : index
    %c0_49 = arith.constant 0 : index
    %65 = vector.load %arg8[%c39, %c0_49] : memref<152x128xf32, #tpu.memory_space<vmem>>, vector<103x128xf32>
    %66 = arith.truncf %65 : vector<103x128xf32> to vector<103x128xbf16>
    %c0_50 = arith.constant 0 : index
    %c768 = arith.constant 768 : index
    %67 = vector.load %arg9[%c0_50, %c768] : memref<103x1152xbf16, #tpu.memory_space<vmem>>, vector<103x128xbf16>
    tpu.vector_store %arg9[%c0_50, %c768], %66 {strides = array<i32>} : memref<103x1152xbf16, #tpu.memory_space<vmem>>, vector<103x128xbf16>,
    %c40_51 = arith.constant 40 : index
    %c0_52 = arith.constant 0 : index
    %68 = vector.load %arg8[%c40_51, %c0_52] : memref<152x128xf32, #tpu.memory_space<vmem>>, vector<103x128xf32>
    %69 = arith.truncf %68 : vector<103x128xf32> to vector<103x128xbf16>
    %c0_53 = arith.constant 0 : index
    %c896 = arith.constant 896 : index
    %70 = vector.load %arg9[%c0_53, %c896] : memref<103x1152xbf16, #tpu.memory_space<vmem>>, vector<103x128xbf16>
    tpu.vector_store %arg9[%c0_53, %c896], %69 {strides = array<i32>} : memref<103x1152xbf16, #tpu.memory_space<vmem>>, vector<103x128xbf16>,
    %c41 = arith.constant 41 : index
    %c0_54 = arith.constant 0 : index
    %71 = vector.load %arg8[%c41, %c0_54] : memref<152x128xf32, #tpu.memory_space<vmem>>, vector<103x128xf32>
    %72 = arith.truncf %71 : vector<103x128xf32> to vector<103x128xbf16>
    %c0_55 = arith.constant 0 : index
    %c1024 = arith.constant 1024 : index
    %73 = vector.load %arg9[%c0_55, %c1024] : memref<103x1152xbf16, #tpu.memory_space<vmem>>, vector<103x128xbf16>
    tpu.vector_store %arg9[%c0_55, %c1024], %72 {strides = array<i32>} : memref<103x1152xbf16, #tpu.memory_space<vmem>>, vector<103x128xbf16>,
    %c0_56 = arith.constant 0 : index
    %c0_57 = arith.constant 0 : index
    %74 = vector.load %arg9[%c0_56, %c0_57] : memref<103x1152xbf16, #tpu.memory_space<vmem>>, vector<103x1152xbf16>
    %c0_58 = arith.constant 0 : index
    %c0_59 = arith.constant 0 : index
    %75 = vector.load %arg5[%c0_58, %c0_59] : memref<1152x128xbf16, #tpu.memory_space<vmem>>, vector<1152x128xbf16>
    %cst_60 = arith.constant dense<0.000000e+00> : vector<103x128xf32>
    %76 = tpu.matmul %74, %75, %cst_60 {dimension_numbers = #tpu.dot_dimension_numbers<[1], [0], [0], [1], [0, 0, 1, 1], [], []>} : vector<103x1152xbf16>, vector<1152x128xbf16>, vector<103x128xf32> -> vector<103x128xf32>
    %c0_61 = arith.constant 0 : index
    %c0_62 = arith.constant 0 : index
    %c0_63 = arith.constant 0 : index
    %77 = vector.load %arg6[%c0_61, %c0_62, %c0_63] : memref<1x112x128xf32, #tpu.memory_space<vmem>>, vector<1x103x128xf32>
    %78 = vector.shape_cast %77 : vector<1x103x128xf32> to vector<103x128xf32>
    %79 = vector.shape_cast %76 : vector<103x128xf32> to vector<1x103x128xf32>
    tpu.vector_store %arg6[%c0_61, %c0_62, %c0_63], %79 {strides = array<i32>} : memref<1x112x128xf32, #tpu.memory_space<vmem>>, vector<1x103x128xf32>,
    return
  }
  func.func @transform_0(%arg0: i32) -> (i32, i32) {
    %c0_i32 = arith.constant 0 : i32
    %c0_i32_0 = arith.constant 0 : i32
    %c0_i32_1 = arith.constant 0 : i32
    return %c0_i32, %c0_i32_0 : i32, i32
  }
  func.func @transform_1(%arg0: i32) -> (i32, i32) {
    %c0_i32 = arith.constant 0 : i32
    %c0_i32_0 = arith.constant 0 : i32
    %c0_i32_1 = arith.constant 0 : i32
    return %c0_i32, %c0_i32_0 : i32, i32
  }
  func.func @transform_2(%arg0: i32) -> (i32, i32) {
    %c0_i32 = arith.constant 0 : i32
    %c0_i32_0 = arith.constant 0 : i32
    %c0_i32_1 = arith.constant 0 : i32
    return %c0_i32, %c0_i32_0 : i32, i32
  }
  func.func @transform_3(%arg0: i32) -> (i32, i32) {
    %c0_i32 = arith.constant 0 : i32
    %c0_i32_0 = arith.constant 0 : i32
    %c0_i32_1 = arith.constant 0 : i32
    return %c0_i32, %c0_i32_0 : i32, i32
  }
  func.func @transform_4(%arg0: i32) -> (i32, i32) {
    %c0_i32 = arith.constant 0 : i32
    %c0_i32_0 = arith.constant 0 : i32
    %c0_i32_1 = arith.constant 0 : i32
    return %c0_i32, %c0_i32_0 : i32, i32
  }
  func.func @transform_5(%arg0: i32) -> (i32, i32, i32) {
    %c0_i32 = arith.constant 0 : i32
    %c0_i32_0 = arith.constant 0 : i32
    %c0_i32_1 = arith.constant 0 : i32
    %c0_i32_2 = arith.constant 0 : i32
    return %c0_i32, %c0_i32_0, %c0_i32_1 : i32, i32, i32
  }
}

</mosaic_0001>

<bundles_post_ra>
// kernel: forward.1
= control target key start
LH: loop header
LB: loop body
LE: loop exit
PB: predicated region body
PF: predicated region fallthrough
CT: control target
= control target key end

     0   :  { %vm406_vm0 = vcmask 261120   ;;  %vm564_vm1 = vcmask 1040384   ;;  %vm720_vm5 = vsmask.f32 3328  ;;  %vm719_vm6 = vcmask 1043456   ;;  %s4125_s1 = inlined_call_operand.vmem [shape: bf16[544,128], index: 1, kind: input, shape index: {}]   ;;  %s4126_s0 = inlined_call_operand.vmem [shape: bf16[49,544], index: 0, kind: input, shape index: {}]   ;;  %s4127_s4 = inlined_call_operand.vmem [shape: bf16[1152,128], index: 4, kind: input, shape index: {}]   ;;  %s4128_s2 = inlined_call_operand.vmem [shape: f32[1,128], index: 2, kind: input, shape index: {}]   ;;  %s4129_s3 = inlined_call_operand.vmem [shape: f32[1,128], index: 3, kind: input, shape index: {}]   ;;  %s4130_s5 = inlined_call_operand.vmem [shape: f32[1,112,128], index: 5, kind: output, shape index: {}]  }
   0x1   :  { %v3132_v0 = vld [vmem:[%s4125_s1 + $0x38] sm:$0xff]  ;;  %v3131_v2 = vld [vmem:[%s4125_s1 + $0x30] sm:$0xff]  ;;  %v3130_v6 = vld [vmem:[%s4125_s1 + $0x28] sm:$0xff] }
   0x2   :  { %v3140_v1 = vld [vmem:[%s4125_s1 + $0x78] sm:$0xff]  ;;  %419 = vmatpush.bf16.msra.mxu0 %v3132_v0  ;;  %v3139_v3 = vld [vmem:[%s4125_s1 + $0x70] sm:$0xff]  ;;  %v3138_v7 = vld [vmem:[%s4125_s1 + $0x68] sm:$0xff] }
   0x3   :  { %3285 = vmatpush.bf16.msra.mxu2 %v3140_v1  ;;  %v3156_v4 = vld [vmem:[%s4125_s1 + $0xf8] sm:$0xff]  ;;  %v3155_v5 = vld [vmem:[%s4125_s1 + $0xf0] sm:$0xff]  ;;  %v3154_v8 = vld [vmem:[%s4125_s1 + $0xe8] sm:$0xff] }
   0x4   :  { %503 = vmatpush.bf16.msra.mxu3 %v3156_v4  ;;  %v3129_v9 = vld [vmem:[%s4125_s1 + $0x20] sm:$0xff]  ;;  %v3128_v12 = vld [vmem:[%s4125_s1 + $0x18] sm:$0xff]  ;;  %v3127_v15 = vld [vmem:[%s4125_s1 + $0x10] sm:$0xff] }
   0x5   :  { %v3137_v10 = vld [vmem:[%s4125_s1 + $0x60] sm:$0xff]  ;;  %v3136_v13 = vld [vmem:[%s4125_s1 + $0x58] sm:$0xff]  ;;  %v3135_v16 = vld [vmem:[%s4125_s1 + $0x50] sm:$0xff] }
   0x6   :  { %420 = vmatpush.bf16.msra.mxu0 %v3131_v2  ;;  %v3153_v11 = vld [vmem:[%s4125_s1 + $0xe0] sm:$0xff]  ;;  %v3152_v14 = vld [vmem:[%s4125_s1 + $0xd8] sm:$0xff]  ;;  %v3151_v17 = vld [vmem:[%s4125_s1 + $0xd0] sm:$0xff] }
   0x7   :  { %3286 = vmatpush.bf16.msra.mxu2 %v3139_v3  ;;  %v3126_v18 = vld [vmem:[%s4125_s1 + $0x8] sm:$0xff]  ;;  %v3125_v21 = vld [vmem:[%s4125_s1] sm:$0xff]  ;;  %v3112_v24 = vld [vmem:[%s4126_s0 + $0x10] sm:$0xf0] }
   0x8   :  { %504 = vmatpush.bf16.msra.mxu3 %v3155_v5  ;;  %v3134_v19 = vld [vmem:[%s4125_s1 + $0x48] sm:$0xff]  ;;  %v3133_v22 = vld [vmem:[%s4125_s1 + $0x40] sm:$0xff]  ;;  %v3148_v27 = vld [vmem:[%s4125_s1 + $0xb8] sm:$0xff] }
   0x9   :  { %v3150_v20 = vld [vmem:[%s4125_s1 + $0xc8] sm:$0xff]  ;;  %v2408_v23 = vld [vmem:[%s4126_s0] sm:$0xf]  ;;  %v3147_v34 = vld [vmem:[%s4125_s1 + $0xb0] sm:$0xff] }
   0xa   :  { %421 = vmatpush.bf16.msra.mxu0 %v3130_v6  ;;  %v3115_v25 = vld [vmem:[%s4126_s0 + $0x2c] sm:$0xf]  ;;  %v2430_v26 = vld [vmem:[%s4126_s0 + $0x3c] sm:$0xf0]  ;;  %v2409_v29 = vor.u32 %v3112_v24, %v2408_v23  ;;  %v2428_v38 = vld [vmem:[%s4126_s0 + $0x28] sm:$0xf] }
   0xb   :  { %3287 = vmatpush.bf16.msra.mxu2 %v3138_v7  ;;  %v3149_v28 = vld [vmem:[%s4125_s1 + $0xc0] sm:$0xff]  ;;  %v2433_v30 = vor.u32 %v3115_v25, %v2430_v26  ;;  %v3111_v31 = vld [vmem:[%s4126_s0 + $0xc] sm:$0xf]  ;;  %v3117_v39 = vld [vmem:[%s4126_s0 + $0x38] sm:$0xf0] }
   0xc   :  { %505 = vmatpush.bf16.msra.mxu3 %v3154_v8  ;;  %v2418_v32 = vld [vmem:[%s4126_s0 + $0x1c] sm:$0xf0]  ;;  %v3158_v33 = vld [vmem:[%s4125_s1 + $0x108] sm:$0xff]  ;;  %v3120_v40 = vld [vmem:[%s4126_s0 + $0x54] sm:$0xf]  ;;  %v2429_v43 = vor.u32 %v3117_v39, %v2428_v38 }
   0xd   :  { %v2421_v35 = vor.u32 %v3111_v31, %v2418_v32  ;;  %v3146_v36 = vld [vmem:[%s4125_s1 + $0xa8] sm:$0xff]  ;;  %v3145_v37 = vld [vmem:[%s4125_s1 + $0xa0] sm:$0xff]  ;;  %v3144_v42 = vld [vmem:[%s4125_s1 + $0x98] sm:$0xff] }
   0xe   :  { %422 = vmatpush.bf16.msra.mxu0 %v3129_v9  ;;  %v2450_v41 = vld [vmem:[%s4126_s0 + $0x64] sm:$0xf0]  ;;  %v3116_v45 = vld [vmem:[%s4126_s0 + $0x34] sm:$0xf]  ;;  %v3157_v49 = vld [vmem:[%s4125_s1 + $0x100] sm:$0xff] }
   0xf   :  { %3288 = vmatpush.bf16.msra.mxu2 %v3137_v10  ;;  %v2453_v44 = vor.u32 %v3120_v40, %v2450_v41  ;;  %v2438_v46 = vld [vmem:[%s4126_s0 + $0x44] sm:$0xf0]  ;;  %v3143_v47 = vld [vmem:[%s4125_s1 + $0x90] sm:$0xff]  ;;  %v39_v51 = vld [vmem:[%s4126_s0 + $0x78] sm:$0x11] }
  0x10   :  { %506 = vmatpush.bf16.msra.mxu3 %v3153_v11  ;;  %v2441_v48 = vor.u32 %v3116_v45, %v2438_v46  ;;  %v3142_v50 = vld [vmem:[%s4125_s1 + $0x88] sm:$0xff]  ;;  %v3141_v52 = vld [vmem:[%s4125_s1 + $0x80] sm:$0xff]  ;;  %v162_v53 = vunpack.c.h.b16 %v39_v51  ;;  %v2448_v54 = vld [vmem:[%s4126_s0 + $0x50] sm:$0xf]  ;;  %v161_v61 = vunpack.c.l.b16 %v39_v51 }
  0x11   :  { %v3122_v55 = vld [vmem:[%s4126_s0 + $0x60] sm:$0xf0]  ;;  %v3121_v58 = vld [vmem:[%s4126_s0 + $0x5c] sm:$0xf]  ;;  %v2458_v59 = vld [vmem:[%s4126_s0 + $0x6c] sm:$0xf0] }
  0x12   :  { %423 = vmatpush.bf16.msra.mxu0 %v3128_v12  ;;  %v2449_v56 = vor.u32 %v3122_v55, %v2448_v54  ;;  %v182_v57 = vpack.c.b16 %v162_v53, %v162_v53  ;;  %v2461_v60 = vor.u32 %v3121_v58, %v2458_v59  ;;  %v40_v62 = vld [vmem:[%s4126_s0 + $0x80] sm:$0x11]  ;;  %v2416_v63 = vld [vmem:[%s4126_s0 + $0x8] sm:$0xf]  ;;  %v3113_v0 = vld [vmem:[%s4126_s0 + $0x18] sm:$0xf0]  ;;  %v181_v2 = vpack.c.b16 %v161_v61, %v161_v61 }
  0x13   :  { %3289 = vmatpush.bf16.msra.mxu2 %v3136_v13  ;;  %v3110_v5 = vld [vmem:[%s4126_s0 + $0x4] sm:$0xf]  ;;  %v2410_v6 = vld [vmem:[%s4126_s0 + $0x14] sm:$0xf0]  ;;  %v2464_v11 = vld [vmem:[%s4126_s0 + $0x60] sm:$0xf]  ;;  %v163_v23 = vunpack.c.l.b16 %v40_v62 }
  0x14   :  { %507 = vmatpush.bf16.msra.mxu3 %v3152_v14  ;;  %v3118_v8 = vld [vmem:[%s4126_s0 + $0x40] sm:$0xf0]  ;;  %v2413_v9 = vor.u32 %v3110_v5, %v2410_v6  ;;  %v3124_v12 = vld [vmem:[%s4126_s0 + $0x70] sm:$0xf0]  ;;  %v2456_v14 = vld [vmem:[%s4126_s0 + $0x58] sm:$0xf] }
  0x15   :  { %v2444_v24 = vld [vmem:[%s4126_s0 + $0x38] sm:$0xf]  ;;  %v3119_v25 = vld [vmem:[%s4126_s0 + $0x48] sm:$0xf0]  ;;  %v183_v26 = vpack.c.b16 %v163_v23, %v163_v23  ;;  %vm3781_vm7 = vmand %vm719_vm6, %vm720_vm5 }
  0x16   :  { %424 = vmatpush.bf16.msra.mxu0 %v3127_v15  ;;  %v41_v15 = vld [vmem:[%s4126_s0 + $0x88] sm:$0x1] }
  0x17   :  { %3290 = vmatpush.bf16.msra.mxu2 %v3135_v16 }
  0x18   :  { %508 = vmatpush.bf16.msra.mxu3 %v3151_v17  ;;  %v2424_v17 = vld [vmem:[%s4126_s0 + $0x10] sm:$0xf] }
  0x1a   :  { %425 = vmatpush.bf16.msra.mxu0 %v3126_v18  ;;  %v3114_v18 = vld [vmem:[%s4126_s0 + $0x20] sm:$0xf0] }
  0x1b   :  { %3291 = vmatpush.bf16.msra.mxu2 %v3134_v19 }
  0x1c   :  { %509 = vmatpush.bf16.msra.mxu3 %v3150_v20 }
  0x1e   :  { %426 = vmatpush.bf16.msra.mxu0 %v3125_v21  ;;  %v2425_v21 = vor.u32 %v3114_v18, %v2424_v17 }
  0x1f   :  { %3292 = vmatpush.bf16.msra.mxu2 %v3133_v22 }
  0x20   :  { %510 = vmatpush.bf16.msra.mxu3 %v3149_v28 }
  0x21   :  { %427 = vmatmul.bf16.vlgmr.msra.gmra.mxu0 %v2409_v29 }
  0x22   :  { %447 = vmatpush.bf16.msrb.mxu0 %v3140_v1  ;;  %460 = vmatmul.bf16.vlgmr.msra.gmra.mxu2 %v2433_v30  ;;  %v164_v1 = vunpack.c.h.b16 %v40_v62 }
  0x23   :  { %475 = vmatpush.bf16.msrb.mxu2 %v3148_v27  ;;  %511 = vmatmul.bf16.vlgmr.msra.gmra.mxu3 %v2421_v35  ;;  %v2445_v27 = vor.u32 %v3119_v25, %v2444_v24 }
  0x24   :  { %3293 = vmatpush.bf16.msrb.mxu3 %v3158_v33  ;;  %v184_v4 = vpack.c.b16 %v164_v1, %v164_v1 }
  0x26   :  { %448 = vmatpush.bf16.msrb.mxu0 %v3139_v3  ;;  %v2417_v3 = vor.u32 %v3113_v0, %v2416_v63 }
  0x27   :  { %476 = vmatpush.bf16.msrb.mxu2 %v3147_v34 }
  0x28   :  { %3294 = vmatpush.bf16.msrb.mxu3 %v3157_v49 }
  0x2a   :  { %449 = vmatpush.bf16.msrb.mxu0 %v3138_v7  ;;  %v2436_v7 = vld [vmem:[%s4126_s0 + $0x30] sm:$0xf] }
  0x2b   :  { %477 = vmatpush.bf16.msrb.mxu2 %v3146_v36 }
  0x2e   :  { %450 = vmatpush.bf16.msrb.mxu0 %v3137_v10  ;;  %v2437_v10 = vor.u32 %v3118_v8, %v2436_v7 }
  0x2f   :  { %478 = vmatpush.bf16.msrb.mxu2 %v3145_v37 }
  0x31   :  { %432 = vmatmul.bf16.gmra.mxu0 %v2429_v43 }
  0x32   :  { %451 = vmatpush.bf16.msrb.mxu0 %v3136_v13  ;;  %465 = vmatmul.bf16.gmra.mxu2 %v2453_v44  ;;  %v2465_v13 = vor.u32 %v3124_v12, %v2464_v11 }
  0x33   :  { %479 = vmatpush.bf16.msrb.mxu2 %v3144_v42  ;;  %516 = vmatmul.bf16.gmra.mxu3 %v2441_v48 }
  0x36   :  { %452 = vmatpush.bf16.msrb.mxu0 %v3135_v16  ;;  %v3123_v16 = vld [vmem:[%s4126_s0 + $0x68] sm:$0xf0] }
  0x37   :  { %480 = vmatpush.bf16.msrb.mxu2 %v3143_v47  ;;  %v2457_v20 = vor.u32 %v3123_v16, %v2456_v14 }
  0x3a   :  { %453 = vmatpush.bf16.msrb.mxu0 %v3134_v19  ;;  %v165_v19 = vunpack.c.l.b16 %v41_v15 }
  0x3b   :  { %481 = vmatpush.bf16.msrb.mxu2 %v3142_v50 }
  0x3e   :  { %454 = vmatpush.bf16.msrb.mxu0 %v3133_v22  ;;  %v185_v22 = vpack.c.b16 %v165_v19, %v165_v19 }
  0x3f   :  { %482 = vmatpush.bf16.msrb.mxu2 %v3141_v52 }
  0x41   :  { %437 = vmatmul.bf16.gmra.mxu0 %v2449_v56 }
  0x42   :  { %537 = vmatpush.bf16.msra.mxu0 %v3158_v33  ;;  %470 = vmatmul.bf16.gmra.mxu2 %v182_v57 }
  0x43   :  { %521 = vmatmul.bf16.gmra.mxu3 %v2461_v60 }
  0x46   :  { %538 = vmatpush.bf16.msra.mxu0 %v3157_v49 }
  0x51   :  { %442 = vmatmul.bf16.gmra.mxu0 %v181_v2 }
  0x52   :  { %483 = vmatmul.bf16.vlgmr.msrb.gmra.mxu2 %v2417_v3 }
  0x53   :  { %526 = vmatmul.bf16.gmra.mxu3 %v184_v4 }
  0x61   :  { %455 = vmatmul.bf16.vlgmr.msrb.gmra.mxu0 %v2413_v9 }
  0x62   :  { %488 = vmatmul.bf16.gmra.mxu2 %v2437_v10 }
  0x63   :  { %2604 = vmatmul.msk.bf16.vlgmr.msrb.gmra.mxu3 %vm406_vm0, %v2465_v13 }
  0x71   :  { %2602 = vmatmul.msk.bf16.vlgmr.msra.gmra.mxu0 %vm406_vm0, %v2425_v21 }
  0x72   :  { %493 = vmatmul.bf16.gmra.mxu2 %v2457_v20 }
  0x73   :  { %2605 = vmatmul.msk.bf16.gmra.mxu3 %vm406_vm0, %v185_v22 }
  0x81   :  { %2603 = vmatmul.msk.bf16.gmra.mxu0 %vm406_vm0, %v2445_v27 }
  0x82   :  { %498 = vmatmul.bf16.gmra.mxu2 %v183_v26 }
  0x9e   :  { %v428_v28 = vpop.f32.mrf.mxu0 }
  0xa5   :  { %v461_v29 = vpop.f32.mrf.mxu2 }
  0xa6   :  { %v430_v30 = vpop.f32.mrf.mxu0  ;;  %v512_v31 = vpop.f32.mrf.mxu3 }
  0xad   :  { %v463_v32 = vpop.f32.mrf.mxu2 }
  0xae   :  { %v433_v33 = vpop.f32.mrf.mxu0  ;;  %v514_v35 = vpop.f32.mrf.mxu3 }
  0xaf   :  { %v462_v34 = vadd.f32 %v461_v29, %v433_v33 }
  0xb5   :  { %v466_v36 = vpop.f32.mrf.mxu2 }
  0xb6   :  { %v435_v37 = vpop.f32.mrf.mxu0  ;;  %v517_v38 = vpop.f32.mrf.mxu3 }
  0xb7   :  { %v464_v12 = vadd.f32 %v463_v32, %v435_v37 }
  0xbd   :  { %v468_v39 = vpop.f32.mrf.mxu2 }
  0xbe   :  { %v438_v40 = vpop.f32.mrf.mxu0  ;;  %v519_v42 = vpop.f32.mrf.mxu3 }
  0xbf   :  { %v467_v41 = vadd.f32 %v466_v36, %v438_v40  ;;  %v3228_v36 = vld [vmem:[%s4127_s4 + $0x78] sm:$0xff] }
  0xc0   :  { %2045 = vmatpush.bf16.msra.mxu2 %v3228_v36 }
  0xc5   :  { %v471_v43 = vpop.f32.mrf.mxu2 }
  0xc6   :  { %v440_v44 = vpop.f32.mrf.mxu0  ;;  %v522_v45 = vpop.f32.mrf.mxu3 }
  0xc7   :  { %v469_v13 = vadd.f32 %v468_v39, %v440_v44 }
  0xcd   :  { %v473_v46 = vpop.f32.mrf.mxu2 }
  0xce   :  { %v443_v47 = vpop.f32.mrf.mxu0  ;;  %v524_v48 = vpop.f32.mrf.mxu3  ;;  %v3227_v46 = vld [vmem:[%s4127_s4 + $0x70] sm:$0xff] }
  0xcf   :  { %v472_v25 = vadd.f32 %v471_v43, %v443_v47  ;;  %2046 = vmatpush.bf16.msra.mxu2 %v3227_v46  ;;  %v3241_v46 = vld [vmem:[%s4127_s4 + $0xe0] sm:$0xff] }
  0xd5   :  { %v484_v49 = vpop.f32.mrf.mxu2 }
  0xd6   :  { %v445_v50 = vpop.f32.mrf.mxu0  ;;  %v527_v51 = vpop.f32.mrf.mxu3 }
  0xdd   :  { %v486_v52 = vpop.f32.mrf.mxu2 }
  0xde   :  { %v456_v53 = vpop.f32.mrf.mxu0  ;;  %v529_v55 = vpop.f32.mrf.mxu3 }
  0xdf   :  { %v457_v54 = vadd.f32 %v456_v53, %v428_v28  ;;  %v3226_v55 = vld [vmem:[%s4127_s4 + $0x68] sm:$0xff] }
  0xe0   :  { %2047 = vmatpush.bf16.msra.mxu2 %v3226_v55  ;;  %v598_v55 = vld [vmem:[%s4128_s2] sm:$0x1] }
  0xe1   :  { %v485_v56 = vadd.f32 %v484_v49, %v457_v54 }
  0xe3   :  { %v513_v57 = vadd.f32 %v512_v31, %v485_v56 }
  0xe5   :  { %v489_v58 = vpop.f32.mrf.mxu2 }
  0xe6   :  { %v490_v59 = vadd.f32 %v489_v58, %v462_v34  ;;  %v458_v60 = vpop.f32.mrf.mxu0  ;;  %v550_v61 = vpop.f32.mrf.mxu3  ;;  %v3219_v58 = vld [vmem:[%s4127_s4 + $0x30] sm:$0xff] }
  0xe7   :  { %v459_v1 = vadd.f32 %v458_v60, %v430_v30 }
  0xe8   :  { %v518_v62 = vadd.f32 %v517_v38, %v490_v59 }
  0xe9   :  { %v487_v3 = vadd.f32 %v486_v52, %v459_v1 }
  0xeb   :  { %v515_v6 = vadd.f32 %v514_v35, %v487_v3  ;;  %v3224_v3 = vld [vmem:[%s4127_s4 + $0x58] sm:$0xff] }
  0xed   :  { %v491_v63 = vpop.f32.mrf.mxu2 }
  0xee   :  { %v540_v0 = vpop.f32.mrf.mxu0  ;;  %v552_v2 = vpop.f32.mrf.mxu3  ;;  %v492_v20 = vadd.f32 %v491_v63, %v464_v12  ;;  %v3223_v12 = vld [vmem:[%s4127_s4 + $0x50] sm:$0xff] }
  0xef   :  { %v3537_v9 = vadd.f32 %v540_v0, %v513_v57  ;;  %v3218_v0 = vld [vmem:[%s4127_s4 + $0x28] sm:$0xff] }
  0xf0   :  { %v520_v31 = vadd.f32 %v519_v42, %v492_v20 }
  0xf1   :  { %v573_v15 = vmul.f32 %v3537_v9, %v3537_v9 }
  0xf5   :  { %v494_v4 = vpop.f32.mrf.mxu2 }
  0xf6   :  { %v542_v5 = vpop.f32.mrf.mxu0  ;;  %v555_v7 = vpop.f32.mrf.mxu3  ;;  %v495_v16 = vadd.f32 %v494_v4, %v467_v41 }
  0xf7   :  { %v3535_v8 = vadd.f32 %v542_v5, %v515_v6  ;;  %v3217_v6 = vld [vmem:[%s4127_s4 + $0x20] sm:$0xff] }
  0xf8   :  { %v523_v26 = vadd.f32 %v522_v45, %v495_v16 }
  0xf9   :  { %v574_v11 = vmul.f32 %v3535_v8, %v3535_v8  ;;  %v559_v17 = vadd.f32 %v3535_v8, %v3537_v9 }
  0xfa   :  { %v3550_v33 = vadd.f32 %v550_v61, %v523_v26  ;;  %v3225_v61 = vld [vmem:[%s4127_s4 + $0x60] sm:$0xff]  ;;  %v3236_v26 = vld [vmem:[%s4127_s4 + $0xb8] sm:$0xff] }
  0xfb   :  { %v580_v21 = vadd.f32 %v574_v11, %v573_v15  ;;  %2048 = vmatpush.bf16.msra.mxu2 %v3225_v61  ;;  %v3298_v11 = vmov 0.0   ;;  %v3216_v15 = vld [vmem:[%s4127_s4 + $0x18] sm:$0xff]  ;;  %2088 = vmatpush.bf16.msra.mxu3 %v3236_v26 }
  0xfc   :  { %v577_v41 = vmul.f32 %v3550_v33, %v3550_v33  ;;  %657 = vst [vmem:[#allocation3 + $0x48] sm:$0xff] %v3298_v11 }
  0xfd   :  { %v496_v10 = vpop.f32.mrf.mxu2  ;;  %659 = vst [vmem:[#allocation3 + $0x58] sm:$0xff] %v3298_v11 }
  0xfe   :  { %v545_v14 = vpop.f32.mrf.mxu0  ;;  %v557_v19 = vpop.f32.mrf.mxu3  ;;  %v497_v22 = vadd.f32 %v496_v10, %v469_v13  ;;  %648 = vst [vmem:[#allocation3] sm:$0xff] %v3298_v11 }
  0xff   :  { %v3545_v18 = vadd.f32 %v545_v14, %v518_v62  ;;  %2049 = vmatpush.bf16.msra.mxu2 %v3224_v3  ;;  %649 = vst [vmem:[#allocation3 + $0x8] sm:$0xff] %v3298_v11  ;;  %v3222_v19 = vld [vmem:[%s4127_s4 + $0x48] sm:$0xff]  ;;  %v611_v3 = vld [vmem:[%s4129_s3] sm:$0x1] }
 0x100   :  { %v525_v29 = vadd.f32 %v524_v48, %v497_v22  ;;  %650 = vst [vmem:[#allocation3 + $0x10] sm:$0xff] %v3298_v11 }
 0x101   :  { %v560_v23 = vadd.f32 %v559_v17, %v3545_v18  ;;  %v575_v24 = vmul.f32 %v3545_v18, %v3545_v18  ;;  %651 = vst [vmem:[#allocation3 + $0x18] sm:$0xff] %v3298_v11 }
 0x102   :  { %v3557_v37 = vadd.f32 %v552_v2, %v525_v29  ;;  %652 = vst [vmem:[#allocation3 + $0x20] sm:$0xff] %v3298_v11 }
 0x103   :  { %v581_v27 = vadd.f32 %v580_v21, %v575_v24  ;;  %2050 = vmatpush.bf16.msra.mxu2 %v3223_v12  ;;  %v3215_v21 = vld [vmem:[%s4127_s4 + $0x10] sm:$0xff]  ;;  %653 = vst [vmem:[#allocation3 + $0x28] sm:$0xff] %v3298_v11  ;;  %v3230_v12 = vld [vmem:[%s4127_s4 + $0x88] sm:$0xff] }
 0x104   :  { %v578_v47 = vmul.f32 %v3557_v37, %v3557_v37  ;;  %654 = vst [vmem:[#allocation3 + $0x30] sm:$0xff] %v3298_v11 }
 0x105   :  { %v499_v28 = vpop.f32.mrf.mxu2  ;;  %655 = vst [vmem:[#allocation3 + $0x38] sm:$0xff] %v3298_v11 }
 0x106   :  { %v500_v30 = vadd.f32 %v499_v28, %v472_v25  ;;  %v547_v32 = vpop.f32.mrf.mxu0  ;;  %656 = vst [vmem:[#allocation3 + $0x40] sm:$0xff] %v3298_v11  ;;  %v3214_v25 = vld [vmem:[%s4127_s4 + $0x8] sm:$0xff]  ;;  %v681_v28 = vld [vmem:[#allocation3 + $0x7] sm:$0xff] }
 0x107   :  { %v3552_v35 = vadd.f32 %v547_v32, %v520_v31  ;;  %2051 = vmatpush.bf16.msra.mxu2 %v3222_v19  ;;  %658 = vst [vmem:[#allocation3 + $0x50] sm:$0xff] %v3298_v11  ;;  %v682_v29 = vld [vmem:[#allocation3 + $0xf] sm:$0xff]  ;;  %v3235_v31 = vld [vmem:[%s4127_s4 + $0xb0] sm:$0xff] }
 0x108   :  { %v528_v34 = vadd.f32 %v527_v51, %v500_v30  ;;  %v3220_v51 = vld [vmem:[%s4127_s4 + $0x38] sm:$0xff]  ;;  %660 = vst [vmem:[#allocation3 + $0x60] sm:$0xff] %v3298_v11  ;;  %v3213_v30 = vld [vmem:[%s4127_s4] sm:$0xff]  ;;  %v3243_v32 = vld [vmem:[%s4127_s4 + $0xf0] sm:$0xff]  ;;  %2089 = vmatpush.bf16.msra.mxu3 %v3235_v31 }
 0x109   :  { %v561_v39 = vadd.f32 %v560_v23, %v3552_v35  ;;  %v576_v40 = vmul.f32 %v3552_v35, %v3552_v35  ;;  %2002 = vmatpush.bf16.msra.mxu1 %v3220_v51  ;;  %v3221_v23 = vld [vmem:[%s4127_s4 + $0x40] sm:$0xff]  ;;  %661 = vst [vmem:[#allocation3 + $0x68] sm:$0xff] %v3298_v11  ;;  %v3251_v51 = vld [vmem:[%s4127_s4 + $0x130] sm:$0xff] }
 0x10a   :  { %v3559_v38 = vadd.f32 %v555_v7, %v528_v34  ;;  %662 = vst [vmem:[#allocation3 + $0x70] sm:$0xff] %v3298_v11  ;;  %v694_v34 = vpack.c.bf16 %v681_v28, %v681_v28 }
 0x10b   :  { %v562_v42 = vadd.f32 %v561_v39, %v3550_v33  ;;  %v582_v43 = vadd.f32 %v581_v27, %v576_v40  ;;  %2052 = vmatpush.bf16.msra.mxu2 %v3221_v23  ;;  %v3244_v27 = vld [vmem:[%s4127_s4 + $0xf8] sm:$0xff]  ;;  %663 = vst [vmem:[#allocation3 + $0x78] sm:$0xff] %v3298_v11  ;;  %v695_v39 = vpack.c.bf16 %v682_v29, %v682_v29 }
 0x10c   :  { %v579_v44 = vmul.f32 %v3559_v38, %v3559_v38  ;;  %v565_v50 = vsel %vm564_vm1, %v3559_v38, 0.0  ;;  %2131 = vmatpush.bf16.msrb.mxu0 %v3244_v27  ;;  %664 = vst [vmem:[#allocation3 + $0x80] sm:$0xff] %v3298_v11 }
 0x10d   :  { %v501_v45 = vpop.f32.mrf.mxu2  ;;  %v563_v48 = vadd.f32 %v562_v42, %v3557_v37  ;;  %v583_v49 = vadd.f32 %v582_v43, %v577_v41  ;;  %2003 = vmatpush.bf16.msra.mxu1 %v3219_v58  ;;  %665 = vst [vmem:[#allocation3 + $0x88] sm:$0xff] %v3298_v11  ;;  %v3299_v41 = vmov 0.0|0.0   ;;  %v3234_v42 = vld [vmem:[%s4127_s4 + $0xa8] sm:$0xff] }
 0x10e   :  { %v585_v54 = vsel %vm564_vm1, %v579_v44, 0.0  ;;  %751 = vst [vmem:[#allocation4 + $0x4] sm:$0xf] %v3299_v41  ;;  %v3242_v43 = vld [vmem:[%s4127_s4 + $0xe8] sm:$0xff]  ;;  %2090 = vmatpush.bf16.msra.mxu3 %v3234_v42  ;;  %v3233_v45 = vld [vmem:[%s4127_s4 + $0xa0] sm:$0xff] }
 0x10f   :  { %v566_v52 = vadd.f32 %v565_v50, %v563_v48  ;;  %v584_v53 = vadd.f32 %v583_v49, %v578_v47  ;;  %752 = vst [vmem:[#allocation4 + $0x28] sm:$0xf] %v3299_v41  ;;  %v3252_v47 = vld [vmem:[%s4127_s4 + $0x138] sm:$0xff] }
 0x110   :  { %2132 = vmatpush.bf16.msrb.mxu0 %v3243_v32  ;;  %707 = vst [vmem:[#allocation4] sm:$0xf] %v694_v34  ;;  %v3232_v50 = vld [vmem:[%s4127_s4 + $0x98] sm:$0xff]  ;;  %v3250_v32 = vld [vmem:[%s4127_s4 + $0x128] sm:$0xff] }
 0x111   :  { %v567_v56 = vrot.slane %v566_v52, 4  ;;  %v586_v57 = vadd.f32 %v585_v54, %v584_v53  ;;  %2004 = vmatpush.bf16.msra.mxu1 %v3218_v0  ;;  %708 = vst [vmem:[#allocation4 + $0x24] sm:$0xf] %v695_v39  ;;  %v3240_v53 = vld [vmem:[%s4127_s4 + $0xd8] sm:$0xff] }
 0x112   :  { %754 = vst [vmem:[#allocation4 + $0x70] sm:$0xf] %v3299_v41  ;;  %2091 = vmatpush.bf16.msra.mxu3 %v3233_v45  ;;  %v684_v54 = vld [vmem:[#allocation3 + $0x1f] sm:$0xff] }
 0x113   :  { %v568_v59 = vadd.f32 %v567_v56, %v566_v52  ;;  %v587_v60 = vrot.slane %v586_v57, 4  ;;  %756 = vst [vmem:[#allocation4 + $0xb8] sm:$0xf] %v3299_v41  ;;  %v697_v58 = vpack.c.bf16 %v684_v54, %v684_v54 }
 0x114   :  { %2133 = vmatpush.bf16.msrb.mxu0 %v3242_v43  ;;  %758 = vst [vmem:[#allocation4 + $0x100] sm:$0xf] %v3299_v41 }
 0x115   :  { %v569_v62 = vrot.slane %v568_v59, 2  ;;  %v588_v63 = vadd.f32 %v587_v60, %v586_v57  ;;  %2005 = vmatpush.bf16.msra.mxu1 %v3217_v6  ;;  %v3159_v52 = vld [vmem:[#allocation4 + $0x4] sm:$0xf]  ;;  %760 = vst [vmem:[#allocation4 + $0x148] sm:$0xf] %v3299_v41 }
 0x116   :  { %v2610_v57 = vld [vmem:[#allocation4 + $0x24] sm:$0xf0]  ;;  %762 = vst [vmem:[#allocation4 + $0x190] sm:$0xf] %v3299_v41  ;;  %2092 = vmatpush.bf16.msra.mxu3 %v3232_v50 }
 0x117   :  { %v570_v1 = vadd.f32 %v569_v62, %v568_v59  ;;  %v589_v2 = vrot.slane %v588_v63, 2  ;;  %v2613_v59 = vor.u32 %v3159_v52, %v2610_v57  ;;  %v2608_v60 = vld [vmem:[#allocation4] sm:$0xf]  ;;  %875 = vst [vmem:[#allocation4 + $0x34] sm:$0xf] %v3299_v41 }
 0x118   :  { %2134 = vmatpush.bf16.msrb.mxu0 %v3241_v46  ;;  %v3163_v62 = vld [vmem:[#allocation4 + $0x20] sm:$0xf0]  ;;  %710 = vst [vmem:[#allocation4 + $0x6c] sm:$0xf] %v697_v58 }
 0x119   :  { %v571_v4 = vrot.slane %v570_v1, 1  ;;  %v590_v5 = vadd.f32 %v589_v2, %v588_v63  ;;  %2006 = vmatpush.bf16.msra.mxu1 %v3216_v15  ;;  %v3231_v63 = vld [vmem:[%s4127_s4 + $0x90] sm:$0xff]  ;;  %2053 = vmatmul.bf16.vlgmr.msra.gmra.mxu2 %v2613_v59  ;;  %834 = vst [vmem:[#allocation4 + $0x30] sm:$0xf] %v697_v58 }
 0x11a   :  { %v3239_v2 = vld [vmem:[%s4127_s4 + $0xd0] sm:$0xff]  ;;  %877 = vst [vmem:[#allocation4 + $0x7c] sm:$0xf] %v3299_v41  ;;  %2093 = vmatpush.bf16.msra.mxu3 %v3231_v63 }
 0x11b   :  { %v572_v7 = vadd.f32 %v571_v4, %v570_v1  ;;  %v591_v10 = vrot.slane %v590_v5, 1  ;;  %v2609_v1 = vor.u32 %v3163_v62, %v2608_v60  ;;  %v766_v4 = vld [vmem:[#allocation3 + $0x9] sm:$0xff]  ;;  %998 = vst [vmem:[#allocation4 + $0x40] sm:$0xf] %v3299_v41 }
 0x11c   :  { %2135 = vmatpush.bf16.msrb.mxu0 %v3240_v53  ;;  %v3249_v60 = vld [vmem:[%s4127_s4 + $0x120] sm:$0xff]  ;;  %879 = vst [vmem:[#allocation4 + $0xc4] sm:$0xf] %v3299_v41 }
 0x11d   :  { %v592_v13 = vadd.f32 %v591_v10, %v590_v5  ;;  %v3600_v14 = vmul.f32 0.020408163, %v572_v7  ;;  %2007 = vmatpush.bf16.msra.mxu1 %v3215_v21  ;;  %v686_v5 = vld [vmem:[#allocation3 + $0x2f] sm:$0xff]  ;;  %v779_v10 = vpack.c.bf16 %v766_v4, %v766_v4  ;;  %1000 = vst [vmem:[#allocation4 + $0x88] sm:$0xf] %v3299_v41 }
 0x11e   :  { %v3686_v11 = vpack.c.bf16 %v686_v5, %v686_v5  ;;  %2094 = vmatpush.bf16.msra.mxu3 %v3230_v12  ;;  %881 = vst [vmem:[#allocation4 + $0x10c] sm:$0xf] %v3299_v41 }
 0x11f   :  { %v594_v16 = vmul.f32 0.020408163, %v592_v13  ;;  %v595_v17 = vmul.f32 %v3600_v14, %v3600_v14  ;;  %v688_v13 = vld [vmem:[#allocation3 + $0x3f] sm:$0xff]  ;;  %792 = vst [vmem:[#allocation4 + $0x8] sm:$0xf] %v779_v10 }
 0x120   :  { %2136 = vmatpush.bf16.msrb.mxu0 %v3239_v2  ;;  %712 = vst [vmem:[#allocation4 + $0xb4] sm:$0xf] %v3686_v11  ;;  %v3172_v4 = vld [vmem:[#allocation4 + $0x68] sm:$0xf0] }
 0x121   :  { %v596_v20 = vsub.f32 %v594_v16, %v595_v17  ;;  %2008 = vmatpush.bf16.msra.mxu1 %v3214_v25  ;;  %836 = vst [vmem:[#allocation4 + $0x78] sm:$0xf] %v3686_v11 }
 0x122   :  { %957 = vst [vmem:[#allocation4 + $0x3c] sm:$0xf] %v3686_v11  ;;  %v3260_v11 = vld [vmem:[%s4127_s4 + $0x178] sm:$0xff] }
 0x123   :  { %v597_v22 = vmax.f32 %v596_v20, 0.0  ;;  %2217 = vmatpush.bf16.msrb.mxu2 %v3260_v11  ;;  %1002 = vst [vmem:[#allocation4 + $0xd0] sm:$0xf] %v3299_v41  ;;  %v3272_v11 = vld [vmem:[%s4127_s4 + $0x1d8] sm:$0xff] }
 0x124   :  { %883 = vst [vmem:[#allocation4 + $0x154] sm:$0xf] %v3299_v41 }
 0x125   :  { %v3616_v24 = vadd.f32 1e-05, %v597_v22  ;;  %2009 = vmatpush.bf16.msra.mxu1 %v3213_v30  ;;  %1004 = vst [vmem:[#allocation4 + $0x118] sm:$0xf] %v3299_v41 }
 0x126   :  { %v2616_v12 = vld [vmem:[#allocation4 + $0x8] sm:$0xf]  ;;  %885 = vst [vmem:[#allocation4 + $0x19c] sm:$0xf] %v3299_v41 }
 0x127   :  { %3296 = vrsqrt.f32 %v3616_v24  ;;  %vm606_vm3 = vweird.f32 %v3616_v24  ;;  %1006 = vst [vmem:[#allocation4 + $0x160] sm:$0xf] %v3299_v41 }
 0x128   :  { %2010 = vmatmul.bf16.vlgmr.msra.gmra.mxu1 %v2609_v1  ;;  %1008 = vst [vmem:[#allocation4 + $0x1a8] sm:$0xf] %v3299_v41  ;;  %v3261_v41 = vld [vmem:[%s4127_s4 + $0x180] sm:$0xff] }
 0x129   :  { %2174 = vmatpush.bf16.msrb.mxu1 %v3252_v47 }
 0x12d   :  { %v3297_v36 = vpop.eup %3296  ;;  %2175 = vmatpush.bf16.msrb.mxu1 %v3251_v51 }
 0x12e   :  { %v601_v40 = vmul.f32 %v3297_v36, %v3616_v24  ;;  %vm607_vm2 = vweird.f32 %v3297_v36  ;;  %v3229_v24 = vld [vmem:[%s4127_s4 + $0x80] sm:$0xff] }
 0x12f   :  { %vm608_vm4 = vmor %vm606_vm3, %vm607_vm2  ;;  %2095 = vmatpush.bf16.msra.mxu3 %v3229_v24 }
 0x130   :  { %v602_v44 = vmul.f32 %v3297_v36, %v601_v40  ;;  %v690_v40 = vld [vmem:[#allocation3 + $0x4f] sm:$0xff] }
 0x131   :  { %2176 = vmatpush.bf16.msrb.mxu1 %v3250_v32  ;;  %v3716_v46 = vpack.c.bf16 %v690_v40, %v690_v40 }
 0x132   :  { %v603_v48 = vmul.f32 0.5, %v602_v44  ;;  %v692_v44 = vld [vmem:[#allocation3 + $0x5f] sm:$0xff] }
 0x133   :  { %716 = vst [vmem:[#allocation4 + $0x144] sm:$0xf] %v3716_v46 }
 0x134   :  { %v604_v49 = vsub.f32 1.5, %v603_v48  ;;  %840 = vst [vmem:[#allocation4 + $0x108] sm:$0xf] %v3716_v46 }
 0x135   :  { %2177 = vmatpush.bf16.msrb.mxu1 %v3249_v60  ;;  %961 = vst [vmem:[#allocation4 + $0xcc] sm:$0xf] %v3716_v46  ;;  %v3256_v46 = vld [vmem:[%s4127_s4 + $0x158] sm:$0xff] }
 0x136   :  { %v605_v56 = vmul.f32 %v3297_v36, %v604_v49  ;;  %v3718_v49 = vpack.c.bf16 %v692_v44, %v692_v44 }
 0x138   :  { %v609_v61 = vsel %vm608_vm4, %v3297_v36, %v605_v56  ;;  %718 = vst [vmem:[#allocation4 + $0x18c] sm:$0xf] %v3718_v49 }
 0x139   :  { %v610_v0 = vmul.f32 %v609_v61, %v598_v55  ;;  %842 = vst [vmem:[#allocation4 + $0x150] sm:$0xf] %v3718_v49 }
 0x13a   :  { %963 = vst [vmem:[#allocation4 + $0x114] sm:$0xf] %v3718_v49 }
 0x13b   :  { %v612_v6 = vmul.f32 %v610_v0, %v3600_v14  ;;  %v615_v7 = vperm.slane %v610_v0, 0  ;;  %v3238_v14 = vld [vmem:[%s4127_s4 + $0xc8] sm:$0xff] }
 0x13c   :  { %2137 = vmatpush.bf16.msrb.mxu0 %v3238_v14 }
 0x13d   :  { %v613_v15 = vsub.f32 %v611_v3, %v612_v6  ;;  %v617_v16 = vmul.f32 %v615_v7, %v3537_v9  ;;  %v619_v17 = vmul.f32 %v615_v7, %v3545_v18  ;;  %v621_v19 = vmul.f32 %v615_v7, %v3550_v33  ;;  %v2646_v6 = vld [vmem:[#allocation4 + $0x6c] sm:$0xf0] }
 0x13e   :  { %v623_v20 = vmul.f32 %v615_v7, %v3559_v38  ;;  %v618_v21 = vmul.f32 %v615_v7, %v3535_v8  ;;  %v620_v22 = vmul.f32 %v615_v7, %v3552_v35  ;;  %v3701_v9 = vpack.c.bf16 %v688_v13, %v688_v13  ;;  %v3237_v35 = vld [vmem:[%s4127_s4 + $0xc0] sm:$0xff] }
 0x13f   :  { %v625_v23 = vperm.slane %v613_v15, 0  ;;  %v622_v18 = vmul.f32 %v615_v7, %v3557_v37  ;;  %v2618_v13 = vld [vmem:[#allocation4 + $0x2c] sm:$0xf0] }
 0x140   :  { %714 = vst [vmem:[#allocation4 + $0xfc] sm:$0xf] %v3701_v9  ;;  %2138 = vmatpush.bf16.msrb.mxu0 %v3237_v35 }
 0x141   :  { %v627_v33 = vadd.f32 %v625_v23, %v617_v16  ;;  %v628_v38 = vadd.f32 %v625_v23, %v618_v21  ;;  %v629_v25 = vadd.f32 %v625_v23, %v619_v17  ;;  %v630_v8 = vadd.f32 %v625_v23, %v620_v22  ;;  %838 = vst [vmem:[#allocation4 + $0xc0] sm:$0xf] %v3701_v9 }
 0x142   :  { %v631_v26 = vadd.f32 %v625_v23, %v621_v19  ;;  %v632_v27 = vadd.f32 %v625_v23, %v622_v18  ;;  %v633_v28 = vadd.f32 %v625_v23, %v623_v20  ;;  %959 = vst [vmem:[#allocation4 + $0x84] sm:$0xf] %v3701_v9  ;;  %v2726_v9 = vld [vmem:[#allocation4 + $0x104] sm:$0xf0] }
 0x143   :  { %v634_v37 = vmax.f32 %v627_v33, 0.0  ;;  %v635_v29 = vmax.f32 %v628_v38, 0.0  ;;  %v636_v30 = vmax.f32 %v629_v25, 0.0  ;;  %v637_v31 = vmax.f32 %v630_v8, 0.0 }
 0x144   :  { %v638_v34 = vmax.f32 %v631_v26, 0.0  ;;  %v639_v36 = vmax.f32 %v632_v27, 0.0  ;;  %v640_v39 = vmax.f32 %v633_v28, 0.0 }
 0x145   :  { %641 = vst [vmem:[#allocation2] sm:$0xff] %v634_v37  ;;  %v3248_v37 = vld [vmem:[%s4127_s4 + $0x118] sm:$0xff] }
 0x146   :  { %642 = vst [vmem:[#allocation2 + $0x8] sm:$0xff] %v635_v29  ;;  %2178 = vmatpush.bf16.msrb.mxu1 %v3248_v37 }
 0x147   :  { %643 = vst [vmem:[#allocation2 + $0x10] sm:$0xff] %v636_v30 }
 0x148   :  { %644 = vst [vmem:[#allocation2 + $0x18] sm:$0xff] %v637_v31 }
 0x149   :  { %645 = vst [vmem:[#allocation2 + $0x20] sm:$0xff] %v638_v34 }
 0x14a   :  { %646 = vst [vmem:[#allocation2 + $0x28] sm:$0xff] %v639_v36 }
 0x14b   :  { %647 = vst [vmem:[#allocation2 + $0x30] sm:$0x1] %v640_v39 }
 0x14c   :  { %v667_v42 = vld [vmem:[#allocation2] sm:$0x7f] }
 0x14d   :  { %668 = vst [vmem:[#allocation3 + $0x18] sm:$0x7f] %v667_v42  ;;  %v669_v43 = vld [vmem:[#allocation2 + $0x7] sm:$0x7f] }
 0x14e   :  { %670 = vst [vmem:[#allocation3 + $0x28] sm:$0x7f] %v669_v43  ;;  %v671_v45 = vld [vmem:[#allocation2 + $0xe] sm:$0x7f] }
 0x14f   :  { %v673_v47 = vld [vmem:[#allocation2 + $0x15] sm:$0x7f]  ;;  %672 = vst [vmem:[#allocation3 + $0x38] sm:$0x7f] %v671_v45 }
 0x150   :  { %674 = vst [vmem:[#allocation3 + $0x48] sm:$0x7f] %v673_v47  ;;  %v675_v48 = vld [vmem:[#allocation2 + $0x1c] sm:$0x7f] }
 0x151   :  { %676 = vst [vmem:[#allocation3 + $0x58] sm:$0x7f] %v675_v48  ;;  %v677_v50 = vld [vmem:[#allocation2 + $0x23] sm:$0x7f] }
 0x152   :  { %678 = vst [vmem:[#allocation3 + $0x68] sm:$0x7f] %v677_v50  ;;  %v722_v47 = vld [vmem:[#allocation4 + $0x1b0] sm:$0xf]  ;;  %v763_v50 = vld [vmem:[#allocation4 + $0x1b4] sm:$0xf] }
 0x154   :  { %v683_v51 = vld [vmem:[#allocation3 + $0x17] sm:$0xff] }
 0x155   :  { %v727_v52 = vld [vmem:[#allocation3 + $0x18] sm:$0xff]  ;;  %v696_v54 = vpack.c.bf16 %v683_v51, %v683_v51  ;;  %v685_v57 = vld [vmem:[#allocation3 + $0x27] sm:$0xff] }
 0x156   :  { %v767_v53 = vld [vmem:[#allocation3 + $0x11] sm:$0xff]  ;;  %v3723_v55 = vpack.c.bf16 %v727_v52, %v727_v52  ;;  %v729_v58 = vld [vmem:[#allocation3 + $0x28] sm:$0xff]  ;;  %v768_v59 = vld [vmem:[#allocation3 + $0x19] sm:$0xff]  ;;  %v3729_v61 = vpack.c.bf16 %v685_v57, %v685_v57 }
 0x157   :  { %v780_v56 = vpack.c.bf16 %v767_v53, %v767_v53  ;;  %709 = vst [vmem:[#allocation4 + $0x48] sm:$0xf] %v696_v54  ;;  %v769_v62 = vld [vmem:[#allocation3 + $0x21] sm:$0xff]  ;;  %v3732_v63 = vpack.c.bf16 %v729_v58, %v729_v58  ;;  %v3734_v0 = vpack.c.bf16 %v768_v59, %v768_v59  ;;  %v687_v1 = vld [vmem:[#allocation3 + $0x37] sm:$0xff]  ;;  %v770_v5 = vld [vmem:[#allocation3 + $0x29] sm:$0xff] }
 0x158   :  { %753 = vst [vmem:[#allocation4 + $0x4c] sm:$0xf] %v3723_v55  ;;  %v3736_v2 = vpack.c.bf16 %v769_v62, %v769_v62  ;;  %v731_v3 = vld [vmem:[#allocation3 + $0x38] sm:$0xff]  ;;  %v3740_v7 = vpack.c.bf16 %v687_v1, %v687_v1  ;;  %v3746_v17 = vpack.c.bf16 %v770_v5, %v770_v5  ;;  %v689_v14 = vld [vmem:[#allocation3 + $0x47] sm:$0xff]  ;;  %v2682_v53 = vld [vmem:[#allocation4 + $0xb4] sm:$0xf0] }
 0x159   :  { %793 = vst [vmem:[#allocation4 + $0x2c] sm:$0xf] %v780_v56  ;;  %v771_v10 = vld [vmem:[#allocation3 + $0x31] sm:$0xff]  ;;  %v3743_v15 = vpack.c.bf16 %v731_v3, %v731_v3  ;;  %v733_v22 = vld [vmem:[#allocation3 + $0x48] sm:$0xff]  ;;  %v772_v24 = vld [vmem:[#allocation3 + $0x39] sm:$0xff]  ;;  %v3753_v25 = vpack.c.bf16 %v689_v14, %v689_v14 }
 0x15a   :  { %833 = vst [vmem:[#allocation4 + $0xc] sm:$0xf] %v696_v54  ;;  %v3749_v21 = vpack.c.bf16 %v771_v10, %v771_v10  ;;  %v773_v8 = vld [vmem:[#allocation3 + $0x41] sm:$0xff]  ;;  %v3756_v26 = vpack.c.bf16 %v733_v22, %v733_v22  ;;  %v3759_v27 = vpack.c.bf16 %v772_v24, %v772_v24  ;;  %v691_v28 = vld [vmem:[#allocation3 + $0x57] sm:$0xff]  ;;  %v774_v31 = vld [vmem:[#allocation3 + $0x49] sm:$0xff] }
 0x15b   :  { %711 = vst [vmem:[#allocation4 + $0x90] sm:$0xf] %v3729_v61  ;;  %v3765_v29 = vpack.c.bf16 %v773_v8, %v773_v8  ;;  %v735_v30 = vld [vmem:[#allocation3 + $0x58] sm:$0xff]  ;;  %v693_v32 = vld [vmem:[#allocation3 + $0x67] sm:$0x7f]  ;;  %v3769_v34 = vpack.c.bf16 %v691_v28, %v691_v28  ;;  %v3775_v42 = vpack.c.bf16 %v774_v31, %v774_v31  ;;  %v818_v3 = vld [vmem:[#allocation3 + $0x6f] sm:$0xff] }
 0x15c   :  { %755 = vst [vmem:[#allocation4 + $0x94] sm:$0xf] %v3732_v63  ;;  %v775_v36 = vld [vmem:[#allocation3 + $0x51] sm:$0xff]  ;;  %v737_v39 = vld [vmem:[#allocation3 + $0x68] sm:$0x7f]  ;;  %v3772_v40 = vpack.c.bf16 %v735_v30, %v735_v30  ;;  %v706_v43 = vpack.c.bf16 %v693_v32, %v693_v32  ;;  %v776_v51 = vld [vmem:[#allocation3 + $0x59] sm:$0xff] }
 0x15d   :  { %794 = vst [vmem:[#allocation4 + $0x50] sm:$0xf] %v3734_v0  ;;  %v3778_v44 = vpack.c.bf16 %v775_v36, %v775_v36  ;;  %v750_v48 = vpack.c.bf16 %v737_v39, %v737_v39  ;;  %v3181_v52 = vld [vmem:[#allocation4 + $0xb0] sm:$0xf0]  ;;  %v777_v54 = vld [vmem:[#allocation3 + $0x61] sm:$0xff]  ;;  %v3793_v1 = vpack.c.bf16 %v776_v51, %v776_v51 }
 0x15e   :  { %v2644_v16 = vld [vmem:[#allocation4 + $0x48] sm:$0xf]  ;;  %795 = vst [vmem:[#allocation4 + $0x74] sm:$0xf] %v3736_v2  ;;  %v817_v56 = vld [vmem:[#allocation3 + $0x67] sm:$0xff]  ;;  %v723_v58 = vsel %vm3781_vm7, %v706_v43, %v722_v47  ;;  %v3259_v47 = vld [vmem:[%s4127_s4 + $0x170] sm:$0xff] }
 0x15f   :  { %v2645_v19 = vor.u32 %v3172_v4, %v2644_v16  ;;  %v3168_v20 = vld [vmem:[#allocation4 + $0x4c] sm:$0xf]  ;;  %835 = vst [vmem:[#allocation4 + $0x54] sm:$0xf] %v3729_v61  ;;  %v778_v59 = vld [vmem:[#allocation3 + $0x69] sm:$0x7f]  ;;  %v764_v62 = vsel %vm3781_vm7, %v750_v48, %v763_v50  ;;  %v3798_v16 = vpack.c.bf16 %v817_v56, %v817_v56  ;;  %2218 = vmatpush.bf16.msrb.mxu2 %v3259_v47 }
 0x160   :  { %v2649_v23 = vor.u32 %v3168_v20, %v2646_v6  ;;  %v3164_v18 = vld [vmem:[#allocation4 + $0x28] sm:$0xf0]  ;;  %713 = vst [vmem:[#allocation4 + $0xd8] sm:$0xf] %v3740_v7  ;;  %v3796_v6 = vpack.c.bf16 %v777_v54, %v777_v54  ;;  %v791_v14 = vpack.c.bf16 %v778_v59, %v778_v59  ;;  %v3800_v20 = vpack.c.bf16 %v818_v3, %v818_v3  ;;  %v804_v22 = vld [vmem:[#allocation4 + $0x1b8] sm:$0xf] }
 0x161   :  { %2015 = vmatmul.bf16.gmra.mxu1 %v2645_v19  ;;  %v2617_v33 = vor.u32 %v3164_v18, %v2616_v12  ;;  %v3160_v38 = vld [vmem:[#allocation4 + $0xc] sm:$0xf]  ;;  %757 = vst [vmem:[#allocation4 + $0xdc] sm:$0xf] %v3743_v15  ;;  %v679_v24 = vld [vmem:[#allocation2 + $0x2a] sm:$0x7f] }
 0x162   :  { %2058 = vmatmul.bf16.gmra.mxu2 %v2649_v23  ;;  %v2621_v35 = vor.u32 %v3160_v38, %v2618_v13  ;;  %796 = vst [vmem:[#allocation4 + $0x98] sm:$0xf] %v3746_v17  ;;  %v2680_v57 = vld [vmem:[#allocation4 + $0x90] sm:$0xf]  ;;  %v2654_v13 = vld [vmem:[#allocation4 + $0x74] sm:$0xf0] }
 0x163   :  { %2096 = vmatmul.bf16.vlgmr.msra.gmra.mxu3 %v2617_v33  ;;  %797 = vst [vmem:[#allocation4 + $0xbc] sm:$0xf] %v3749_v21  ;;  %v3177_v60 = vld [vmem:[#allocation4 + $0x94] sm:$0xf]  ;;  %v2681_v10 = vor.u32 %v3181_v52, %v2680_v57  ;;  %v805_v33 = vsel %vm3781_vm7, %v791_v14, %v804_v22  ;;  %v3247_v38 = vld [vmem:[%s4127_s4 + $0x110] sm:$0xff]  ;;  %v3254_v14 = vld [vmem:[%s4127_s4 + $0x148] sm:$0xff] }
 0x164   :  { %2139 = vmatmul.bf16.vlgmr.msrb.gmra.mxu0 %v2621_v35  ;;  %837 = vst [vmem:[#allocation4 + $0x9c] sm:$0xf] %v3740_v7  ;;  %v2652_v4 = vld [vmem:[#allocation4 + $0x50] sm:$0xf]  ;;  %v2685_v19 = vor.u32 %v3177_v60, %v2682_v53  ;;  %2179 = vmatpush.bf16.msrb.mxu1 %v3247_v38  ;;  %v3190_v8 = vld [vmem:[#allocation4 + $0xf8] sm:$0xf0] }
 0x165   :  { %715 = vst [vmem:[#allocation4 + $0x120] sm:$0xf] %v3753_v25  ;;  %v3173_v5 = vld [vmem:[#allocation4 + $0x70] sm:$0xf0]  ;;  %v845_v35 = vld [vmem:[#allocation4 + $0x1bc] sm:$0xf] }
 0x166   :  { %759 = vst [vmem:[#allocation4 + $0x124] sm:$0xf] %v3756_v26  ;;  %v3169_v12 = vld [vmem:[#allocation4 + $0x54] sm:$0xf]  ;;  %v2653_v23 = vor.u32 %v3173_v5, %v2652_v4  ;;  %v2718_v31 = vld [vmem:[#allocation4 + $0xfc] sm:$0xf0] }
 0x167   :  { %798 = vst [vmem:[#allocation4 + $0xe0] sm:$0xf] %v3759_v27  ;;  %v2657_v18 = vor.u32 %v3169_v12, %v2654_v13  ;;  %v2716_v28 = vld [vmem:[#allocation4 + $0xd8] sm:$0xf]  ;;  %v2690_v39 = vld [vmem:[#allocation4 + $0xbc] sm:$0xf0] }
 0x168   :  { %799 = vst [vmem:[#allocation4 + $0x104] sm:$0xf] %v3765_v29  ;;  %v3186_v30 = vld [vmem:[#allocation4 + $0xdc] sm:$0xf]  ;;  %v3199_v50 = vld [vmem:[#allocation4 + $0x140] sm:$0xf0] }
 0x169   :  { %839 = vst [vmem:[#allocation4 + $0xe4] sm:$0xf] %v3753_v25  ;;  %v3257_v54 = vld [vmem:[%s4127_s4 + $0x160] sm:$0xff]  ;;  %v3267_v59 = vld [vmem:[%s4127_s4 + $0x1b0] sm:$0xff] }
 0x16a   :  { %717 = vst [vmem:[#allocation4 + $0x168] sm:$0xf] %v3769_v34  ;;  %v3182_v36 = vld [vmem:[#allocation4 + $0xb8] sm:$0xf0]  ;;  %v3245_v57 = vld [vmem:[%s4127_s4 + $0x100] sm:$0xff]  ;;  %v3275_v60 = vld [vmem:[%s4127_s4 + $0x1f0] sm:$0xff] }
 0x16b   :  { %761 = vst [vmem:[#allocation4 + $0x16c] sm:$0xf] %v3772_v40  ;;  %v2790_v13 = vld [vmem:[#allocation4 + $0x18c] sm:$0xf0] }
 0x16c   :  { %800 = vst [vmem:[#allocation4 + $0x128] sm:$0xf] %v3775_v42  ;;  %v2752_v48 = vld [vmem:[#allocation4 + $0x120] sm:$0xf]  ;;  %v1012_v47 = vld [vmem:[#allocation3 + $0x29] sm:$0xff] }
 0x16d   :  { %801 = vst [vmem:[#allocation4 + $0x14c] sm:$0xf] %v3778_v44  ;;  %v2753_v52 = vor.u32 %v3199_v50, %v2752_v48  ;;  %v1013_v48 = vld [vmem:[#allocation3 + $0x31] sm:$0xff] }
 0x16e   :  { %841 = vst [vmem:[#allocation4 + $0x12c] sm:$0xf] %v3769_v34  ;;  %v3283_v50 = vld [vmem:[%s4127_s4 + $0x230] sm:$0xff] }
 0x16f   :  { %724 = vst [vmem:[#allocation4 + $0x1b0] sm:$0xf] %v723_v58  ;;  %v3191_v51 = vld [vmem:[#allocation4 + $0x100] sm:$0xf0]  ;;  %v858_v58 = vld [vmem:[#allocation3 + $0x68] sm:$0xff] }
 0x170   :  { %765 = vst [vmem:[#allocation4 + $0x1b4] sm:$0xf] %v764_v62  ;;  %v3187_v53 = vld [vmem:[#allocation4 + $0xe4] sm:$0xf]  ;;  %v871_v3 = vpack.c.bf16 %v858_v58, %v858_v58 }
 0x171   :  { %2020 = vmatmul.bf16.gmra.mxu1 %v2681_v10  ;;  %802 = vst [vmem:[#allocation4 + $0x170] sm:$0xf] %v3793_v1  ;;  %v3255_v62 = vld [vmem:[%s4127_s4 + $0x150] sm:$0xff]  ;;  %v2788_v5 = vld [vmem:[#allocation4 + $0x168] sm:$0xf]  ;;  %v3266_v10 = vld [vmem:[%s4127_s4 + $0x1a8] sm:$0xff] }
 0x172   :  { %2063 = vmatmul.bf16.gmra.mxu2 %v2685_v19  ;;  %803 = vst [vmem:[#allocation4 + $0x194] sm:$0xf] %v3796_v6 }
 0x173   :  { %2101 = vmatmul.bf16.gmra.mxu3 %v2653_v23  ;;  %843 = vst [vmem:[#allocation4 + $0x174] sm:$0xf] %v3798_v16  ;;  %v3204_v23 = vld [vmem:[#allocation4 + $0x16c] sm:$0xf] }
 0x174   :  { %2144 = vmatmul.bf16.gmra.mxu0 %v2657_v18  ;;  %844 = vst [vmem:[#allocation4 + $0x198] sm:$0xf] %v3800_v20  ;;  %v2760_v18 = vld [vmem:[#allocation4 + $0x128] sm:$0xf] }
 0x175   :  { %680 = vst [vmem:[#allocation3 + $0x78] sm:$0x7f] %v679_v24  ;;  %v3200_v24 = vld [vmem:[#allocation4 + $0x148] sm:$0xf0] }
 0x176   :  { %806 = vst [vmem:[#allocation4 + $0x1b8] sm:$0xf] %v805_v33  ;;  %v3196_v33 = vld [vmem:[#allocation4 + $0x12c] sm:$0xf] }
 0x177   :  { %874 = vst [vmem:[#allocation4 + $0x10] sm:$0xf] %v3723_v55  ;;  %v2688_v55 = vld [vmem:[#allocation4 + $0x98] sm:$0xf] }
 0x178   :  { %915 = vst [vmem:[#allocation4 + $0x14] sm:$0xf] %v3734_v0  ;;  %v2717_v0 = vor.u32 %v3190_v8, %v2716_v28  ;;  %v3265_v8 = vld [vmem:[%s4127_s4 + $0x1a0] sm:$0xff] }
 0x179   :  { %916 = vst [vmem:[#allocation4 + $0x38] sm:$0xf] %v3736_v2  ;;  %v3178_v2 = vld [vmem:[#allocation4 + $0x9c] sm:$0xf]  ;;  %v2796_v58 = vld [vmem:[#allocation4 + $0x170] sm:$0xf] }
 0x17a   :  { %876 = vst [vmem:[#allocation4 + $0x58] sm:$0xf] %v3732_v63 }
 0x17b   :  { %917 = vst [vmem:[#allocation4 + $0x5c] sm:$0xf] %v3746_v17  ;;  %v2721_v17 = vor.u32 %v3186_v30, %v2718_v31  ;;  %v3253_v30 = vld [vmem:[%s4127_s4 + $0x140] sm:$0xff]  ;;  %v927_v31 = vld [vmem:[#allocation4 + $0x1c4] sm:$0xf] }
 0x17c   :  { %v819_v37 = vld [vmem:[#allocation3 + $0x77] sm:$0x7f]  ;;  %918 = vst [vmem:[#allocation4 + $0x80] sm:$0xf] %v3749_v21  ;;  %v2689_v21 = vor.u32 %v3182_v36, %v2688_v55  ;;  %v2793_v55 = vor.u32 %v3204_v23, %v2790_v13  ;;  %v2761_v36 = vor.u32 %v3200_v24, %v2760_v18  ;;  %v3269_v23 = vld [vmem:[%s4127_s4 + $0x1c0] sm:$0xff] }
 0x17d   :  { %v832_v32 = vpack.c.bf16 %v819_v37, %v819_v37  ;;  %956 = vst [vmem:[#allocation4 + $0x18] sm:$0xf] %v3729_v61  ;;  %v2693_v61 = vor.u32 %v3178_v2, %v2690_v39  ;;  %v900_v4 = vld [vmem:[#allocation3 + $0x71] sm:$0xff]  ;;  %v901_v22 = vld [vmem:[#allocation3 + $0x79] sm:$0x7f] }
 0x17e   :  { %997 = vst [vmem:[#allocation4 + $0x1c] sm:$0xf] %v3732_v63  ;;  %v3246_v63 = vld [vmem:[%s4127_s4 + $0x108] sm:$0xff]  ;;  %v860_v49 = vld [vmem:[#allocation3 + $0x78] sm:$0x7f]  ;;  %v3894_v19 = vpack.c.bf16 %v900_v4, %v900_v4  ;;  %v914_v28 = vpack.c.bf16 %v901_v22, %v901_v22 }
 0x17f   :  { %v846_v43 = vsel %vm3781_vm7, %v832_v32, %v845_v35  ;;  %878 = vst [vmem:[#allocation4 + $0xa0] sm:$0xf] %v3743_v15  ;;  %2180 = vmatpush.bf16.msrb.mxu1 %v3246_v63  ;;  %v873_v38 = vpack.c.bf16 %v860_v49, %v860_v49  ;;  %v886_v35 = vld [vmem:[#allocation4 + $0x1c0] sm:$0xf]  ;;  %v3205_v4 = vld [vmem:[#allocation4 + $0x174] sm:$0xf] }
 0x180   :  { %847 = vst [vmem:[#allocation4 + $0x1bc] sm:$0xf] %v846_v43  ;;  %v940_v32 = vld [vmem:[#allocation3 + $0x77] sm:$0xff]  ;;  %v928_v43 = vsel %vm3781_vm7, %v914_v28, %v927_v31  ;;  %v3161_v31 = vld [vmem:[#allocation4 + $0x14] sm:$0xf] }
 0x181   :  { %2025 = vmatmul.bf16.gmra.mxu1 %v2717_v0  ;;  %919 = vst [vmem:[#allocation4 + $0xa4] sm:$0xf] %v3759_v27  ;;  %v3258_v27 = vld [vmem:[%s4127_s4 + $0x168] sm:$0xff]  ;;  %v3273_v0 = vld [vmem:[%s4127_s4 + $0x1e0] sm:$0xff]  ;;  %v887_v2 = vsel %vm3781_vm7, %v873_v38, %v886_v35  ;;  %v1022_v49 = vld [vmem:[#allocation3 + $0x79] sm:$0xff] }
 0x182   :  { %2068 = vmatmul.bf16.gmra.mxu2 %v2721_v17  ;;  %920 = vst [vmem:[#allocation4 + $0xc8] sm:$0xf] %v3765_v29  ;;  %v2754_v29 = vld [vmem:[#allocation4 + $0x144] sm:$0xf0]  ;;  %v1035_v24 = vpack.c.bf16 %v1022_v49, %v1022_v49  ;;  %v3165_v35 = vld [vmem:[#allocation4 + $0x30] sm:$0xf0] }
 0x183   :  { %2106 = vmatmul.bf16.gmra.mxu3 %v2689_v21  ;;  %958 = vst [vmem:[#allocation4 + $0x60] sm:$0xf] %v3740_v7  ;;  %v3195_v7 = vld [vmem:[#allocation4 + $0x124] sm:$0xf]  ;;  %2219 = vmatpush.bf16.msrb.mxu2 %v3258_v27 }
 0x184   :  { %2149 = vmatmul.bf16.gmra.mxu0 %v2693_v61  ;;  %999 = vst [vmem:[#allocation4 + $0x64] sm:$0xf] %v3743_v15  ;;  %v2724_v15 = vld [vmem:[#allocation4 + $0xe0] sm:$0xf]  ;;  %v2757_v56 = vor.u32 %v3195_v7, %v2754_v29  ;;  %2181 = vmatpush.bf16.msrb.mxu1 %v3245_v57  ;;  %v941_v17 = vld [vmem:[#allocation3 + $0x7f] sm:$0xff] }
 0x185   :  { %880 = vst [vmem:[#allocation4 + $0xe8] sm:$0xf] %v3756_v26  ;;  %v981_v21 = vld [vmem:[#allocation3 + $0x78] sm:$0xff]  ;;  %v3264_v61 = vld [vmem:[%s4127_s4 + $0x198] sm:$0xff]  ;;  %v954_v63 = vpack.c.bf16 %v941_v17, %v941_v17  ;;  %v3174_v17 = vld [vmem:[#allocation4 + $0x78] sm:$0xf0] }
 0x186   :  { %921 = vst [vmem:[#allocation4 + $0xec] sm:$0xf] %v3775_v42  ;;  %v2725_v42 = vor.u32 %v3191_v51, %v2724_v15  ;;  %v3263_v27 = vld [vmem:[%s4127_s4 + $0x190] sm:$0xff]  ;;  %v994_v29 = vpack.c.bf16 %v981_v21, %v981_v21  ;;  %v1025_v15 = vpack.c.bf16 %v1012_v47, %v1012_v47  ;;  %v1015_v51 = vld [vmem:[#allocation3 + $0x41] sm:$0xff] }
 0x187   :  { %922 = vst [vmem:[#allocation4 + $0x110] sm:$0xf] %v3778_v44  ;;  %v2729_v44 = vor.u32 %v3187_v53, %v2726_v9  ;;  %2220 = vmatpush.bf16.msrb.mxu2 %v3257_v54  ;;  %v1014_v7 = vld [vmem:[#allocation3 + $0x39] sm:$0xff]  ;;  %v1113_v9 = vld [vmem:[#allocation4 + $0x1b0] sm:$0xff]  ;;  %v1026_v53 = vpack.c.bf16 %v1013_v48, %v1013_v48  ;;  %v1114_v38 = vld [vmem:[#allocation4 + $0x1b8] sm:$0xff] }
 0x188   :  { %960 = vst [vmem:[#allocation4 + $0xa8] sm:$0xf] %v3753_v25  ;;  %v3268_v25 = vld [vmem:[%s4127_s4 + $0x1b8] sm:$0xff]  ;;  %v1016_v54 = vld [vmem:[#allocation3 + $0x49] sm:$0xff]  ;;  %v1436_v57 = vunpack.c.h.b16 %v1113_v9  ;;  %v2662_v21 = vld [vmem:[#allocation4 + $0x7c] sm:$0xf0] }
 0x189   :  { %1001 = vst [vmem:[#allocation4 + $0xac] sm:$0xf] %v3756_v26  ;;  %v3276_v26 = vld [vmem:[%s4127_s4 + $0x1f8] sm:$0xff]  ;;  %2260 = vmatpush.bf16.msrb.mxu3 %v3268_v25  ;;  %v1028_v25 = vpack.c.bf16 %v1015_v51, %v1015_v51  ;;  %v2634_v47 = vld [vmem:[#allocation4 + $0x3c] sm:$0xf0] }
 0x18a   :  { %882 = vst [vmem:[#allocation4 + $0x130] sm:$0xf] %v3772_v40  ;;  %2303 = vmatpush.bf16.msra.mxu0 %v3276_v26  ;;  %v1018_v26 = vld [vmem:[#allocation3 + $0x59] sm:$0xff]  ;;  %v1499_v13 = vpack.c.b16 %v1436_v57, %v1436_v57 }
 0x18b   :  { %923 = vst [vmem:[#allocation4 + $0x134] sm:$0xf] %v3793_v1  ;;  %2221 = vmatpush.bf16.msrb.mxu2 %v3256_v46  ;;  %v899_v1 = vld [vmem:[#allocation3 + $0x69] sm:$0xff]  ;;  %v1435_v46 = vunpack.c.l.b16 %v1113_v9  ;;  %v2696_v9 = vld [vmem:[#allocation4 + $0xa0] sm:$0xf] }
 0x18c   :  { %924 = vst [vmem:[#allocation4 + $0x158] sm:$0xf] %v3796_v6  ;;  %v3208_v6 = vld [vmem:[#allocation4 + $0x188] sm:$0xf0]  ;;  %v3888_v12 = vpack.c.bf16 %v899_v1, %v899_v1  ;;  %v3270_v1 = vld [vmem:[%s4127_s4 + $0x1c8] sm:$0xff] }
 0x18d   :  { %962 = vst [vmem:[#allocation4 + $0xf0] sm:$0xf] %v3769_v34  ;;  %2261 = vmatpush.bf16.msrb.mxu3 %v3267_v59  ;;  %v3274_v34 = vld [vmem:[%s4127_s4 + $0x1e8] sm:$0xff]  ;;  %v2789_v37 = vor.u32 %v3208_v6, %v2788_v5  ;;  %v1029_v59 = vpack.c.bf16 %v1016_v54, %v1016_v54  ;;  %v1031_v5 = vpack.c.bf16 %v1018_v26, %v1018_v26  ;;  %v3188_v49 = vld [vmem:[#allocation4 + $0xec] sm:$0xf] }
 0x18e   :  { %2304 = vmatpush.bf16.msra.mxu0 %v3275_v60  ;;  %1003 = vst [vmem:[#allocation4 + $0xf4] sm:$0xf] %v3772_v40  ;;  %v2762_v40 = vld [vmem:[#allocation4 + $0x14c] sm:$0xf0]  ;;  %v1498_v6 = vpack.c.b16 %v1435_v46, %v1435_v46  ;;  %v3171_v46 = vld [vmem:[#allocation4 + $0x64] sm:$0xf] }
 0x18f   :  { %2222 = vmatpush.bf16.msrb.mxu2 %v3255_v62  ;;  %884 = vst [vmem:[#allocation4 + $0x178] sm:$0xf] %v871_v3  ;;  %v2765_v39 = vor.u32 %v3196_v33, %v2762_v40  ;;  %v1019_v60 = vld [vmem:[#allocation3 + $0x61] sm:$0xff]  ;;  %v3209_v62 = vld [vmem:[#allocation4 + $0x190] sm:$0xf0]  ;;  %v3282_v40 = vld [vmem:[%s4127_s4 + $0x228] sm:$0xff] }
 0x190   :  { %925 = vst [vmem:[#allocation4 + $0x17c] sm:$0xf] %v3888_v12  ;;  %v2797_v22 = vor.u32 %v3209_v62, %v2796_v58 }
 0x191   :  { %2030 = vmatmul.bf16.gmra.mxu1 %v2753_v52  ;;  %2262 = vmatpush.bf16.msrb.mxu3 %v3266_v10  ;;  %926 = vst [vmem:[#allocation4 + $0x1a0] sm:$0xf] %v3894_v19  ;;  %v3271_v52 = vld [vmem:[%s4127_s4 + $0x1d0] sm:$0xff]  ;;  %v2798_v10 = vld [vmem:[#allocation4 + $0x194] sm:$0xf0] }
 0x192   :  { %2073 = vmatmul.bf16.gmra.mxu2 %v2757_v56  ;;  %2305 = vmatpush.bf16.msra.mxu0 %v3274_v34  ;;  %964 = vst [vmem:[#allocation4 + $0x138] sm:$0xf] %v3798_v16  ;;  %v953_v16 = vpack.c.bf16 %v940_v32, %v940_v32  ;;  %v3262_v56 = vld [vmem:[%s4127_s4 + $0x188] sm:$0xff]  ;;  %v1032_v34 = vpack.c.bf16 %v1019_v60, %v1019_v60 }
 0x193   :  { %2111 = vmatmul.bf16.gmra.mxu3 %v2725_v42  ;;  %2223 = vmatpush.bf16.msrb.mxu2 %v3254_v14  ;;  %965 = vst [vmem:[#allocation4 + $0x15c] sm:$0xf] %v3800_v20  ;;  %v3284_v20 = vld [vmem:[%s4127_s4 + $0x238] sm:$0xff]  ;;  %v1027_v42 = vpack.c.bf16 %v1014_v7, %v1014_v7  ;;  %v2801_v18 = vor.u32 %v3205_v4, %v2798_v10  ;;  %v2626_v32 = vld [vmem:[#allocation4 + $0x34] sm:$0xf0] }
 0x194   :  { %2154 = vmatmul.bf16.gmra.mxu0 %v2729_v44  ;;  %1005 = vst [vmem:[#allocation4 + $0x13c] sm:$0xf] %v871_v3  ;;  %2346 = vmatpush.bf16.msra.mxu1 %v3284_v20  ;;  %v1017_v44 = vld [vmem:[#allocation3 + $0x51] sm:$0xff]  ;;  %v1023_v14 = vld [vmem:[#allocation3 + $0x81] sm:$0xff] }
 0x195   :  { %2263 = vmatpush.bf16.msrb.mxu3 %v3265_v8  ;;  %888 = vst [vmem:[#allocation4 + $0x1c0] sm:$0xf] %v887_v2  ;;  %v1030_v3 = vpack.c.bf16 %v1017_v44, %v1017_v44  ;;  %v1036_v33 = vpack.c.bf16 %v1023_v14, %v1023_v14  ;;  %v2624_v8 = vld [vmem:[#allocation4 + $0x10] sm:$0xf]  ;;  %v2629_v2 = vor.u32 %v3161_v31, %v2626_v32  ;;  %v2632_v20 = vld [vmem:[#allocation4 + $0x18] sm:$0xf] }
 0x196   :  { %2306 = vmatpush.bf16.msra.mxu0 %v3273_v0  ;;  %929 = vst [vmem:[#allocation4 + $0x1c4] sm:$0xf] %v928_v43  ;;  %v2625_v0 = vor.u32 %v3165_v35, %v2624_v8  ;;  %v2660_v43 = vld [vmem:[#allocation4 + $0x58] sm:$0xf]  ;;  %v3280_v7 = vld [vmem:[%s4127_s4 + $0x218] sm:$0xff] }
 0x197   :  { %2224 = vmatpush.bf16.msrb.mxu2 %v3253_v30  ;;  %966 = vst [vmem:[#allocation4 + $0x180] sm:$0xf] %v953_v16  ;;  %v1437_v30 = vunpack.c.l.b16 %v1114_v38  ;;  %v3170_v16 = vld [vmem:[#allocation4 + $0x5c] sm:$0xf]  ;;  %v3192_v10 = vld [vmem:[#allocation4 + $0x108] sm:$0xf0] }
 0x198   :  { %967 = vst [vmem:[#allocation4 + $0x1a4] sm:$0xf] %v954_v63  ;;  %2347 = vmatpush.bf16.msra.mxu1 %v3283_v50  ;;  %v3162_v63 = vld [vmem:[#allocation4 + $0x1c] sm:$0xf] }
 0x199   :  { %2264 = vmatpush.bf16.msrb.mxu3 %v3264_v61  ;;  %1007 = vst [vmem:[#allocation4 + $0x184] sm:$0xf] %v994_v29  ;;  %v3166_v61 = vld [vmem:[#allocation4 + $0x38] sm:$0xf0]  ;;  %v2637_v48 = vor.u32 %v3162_v63, %v2634_v47 }
 0x19a   :  { %2307 = vmatpush.bf16.msra.mxu0 %v3272_v11  ;;  %1038 = vst [vmem:[#allocation4 + $0x20] sm:$0xf] %v1025_v15  ;;  %v2661_v11 = vor.u32 %v3174_v17, %v2660_v43  ;;  %v2633_v29 = vor.u32 %v3166_v61, %v2632_v20  ;;  %v3183_v15 = vld [vmem:[#allocation4 + $0xc0] sm:$0xf0]  ;;  %v3197_v43 = vld [vmem:[#allocation4 + $0x134] sm:$0xf] }
 0x19b   :  { %1039 = vst [vmem:[#allocation4 + $0x44] sm:$0xf] %v1026_v53  ;;  %v2698_v53 = vld [vmem:[#allocation4 + $0xc4] sm:$0xf0]  ;;  %v2697_v44 = vor.u32 %v3183_v15, %v2696_v9  ;;  %v2770_v17 = vld [vmem:[#allocation4 + $0x154] sm:$0xf0] }
 0x19c   :  { %1040 = vst [vmem:[#allocation4 + $0x68] sm:$0xf] %v1027_v42  ;;  %2348 = vmatpush.bf16.msra.mxu1 %v3282_v40  ;;  %v3175_v42 = vld [vmem:[#allocation4 + $0x80] sm:$0xf0]  ;;  %v3180_v40 = vld [vmem:[#allocation4 + $0xac] sm:$0xf] }
 0x19d   :  { %2265 = vmatpush.bf16.msrb.mxu3 %v3263_v27  ;;  %1041 = vst [vmem:[#allocation4 + $0x8c] sm:$0xf] %v1028_v25  ;;  %v2665_v27 = vor.u32 %v3170_v16, %v2662_v21  ;;  %v2670_v25 = vld [vmem:[#allocation4 + $0x84] sm:$0xf0]  ;;  %v2740_v61 = vld [vmem:[#allocation4 + $0xf0] sm:$0xf] }
 0x19e   :  { %2308 = vmatpush.bf16.msra.mxu0 %v3271_v52  ;;  %1042 = vst [vmem:[#allocation4 + $0xb0] sm:$0xf] %v1029_v59  ;;  %v3179_v52 = vld [vmem:[#allocation4 + $0xa4] sm:$0xf]  ;;  %v2673_v59 = vor.u32 %v3171_v46, %v2670_v25  ;;  %v2804_v25 = vld [vmem:[#allocation4 + $0x178] sm:$0xf] }
 0x19f   :  { %1043 = vst [vmem:[#allocation4 + $0xd4] sm:$0xf] %v1030_v3  ;;  %v2701_v26 = vor.u32 %v3179_v52, %v2698_v53  ;;  %v3277_v52 = vld [vmem:[%s4127_s4 + $0x200] sm:$0xff] }
 0x1a0   :  { %1044 = vst [vmem:[#allocation4 + $0xf8] sm:$0xf] %v1031_v5  ;;  %v3279_v5 = vld [vmem:[%s4127_s4 + $0x210] sm:$0xff] }
 0x1a1   :  { %2035 = vmatmul.bf16.gmra.mxu1 %v2789_v37  ;;  %2266 = vmatpush.bf16.msrb.mxu3 %v3262_v56  ;;  %1045 = vst [vmem:[#allocation4 + $0x11c] sm:$0xf] %v1032_v34  ;;  %v2054_v37 = vpop.f32.mrf.mxu2  ;;  %v2668_v56 = vld [vmem:[#allocation4 + $0x60] sm:$0xf] }
 0x1a2   :  { %2078 = vmatmul.bf16.gmra.mxu2 %v2793_v55  ;;  %2309 = vmatpush.bf16.msra.mxu0 %v3270_v1  ;;  %1046 = vst [vmem:[#allocation4 + $0x140] sm:$0xf] %v3888_v12  ;;  %v2669_v58 = vor.u32 %v3175_v42, %v2668_v56 }
 0x1a3   :  { %2116 = vmatmul.bf16.gmra.mxu3 %v2761_v36  ;;  %1047 = vst [vmem:[#allocation4 + $0x164] sm:$0xf] %v3894_v19  ;;  %v1438_v36 = vunpack.c.h.b16 %v1114_v38  ;;  %v3281_v19 = vld [vmem:[%s4127_s4 + $0x220] sm:$0xff] }
 0x1a4   :  { %2159 = vmatmul.bf16.gmra.mxu0 %v2765_v39  ;;  %1048 = vst [vmem:[#allocation4 + $0x188] sm:$0xf] %v1035_v24  ;;  %v1500_v39 = vpack.c.b16 %v1437_v30, %v1437_v30  ;;  %2349 = vmatpush.bf16.msra.mxu1 %v3281_v19  ;;  %v3184_v24 = vld [vmem:[#allocation4 + $0xc8] sm:$0xf0]  ;;  %v2706_v38 = vld [vmem:[#allocation4 + $0xcc] sm:$0xf0] }
 0x1a5   :  { %2267 = vmatpush.bf16.msrb.mxu3 %v3261_v41  ;;  %1049 = vst [vmem:[#allocation4 + $0x1ac] sm:$0xf] %v1036_v33  ;;  %v2011_v28 = vpop.f32.mrf.mxu1  ;;  %v1501_v12 = vpack.c.b16 %v1438_v36, %v1438_v36 }
 0x1a6   :  { %2310 = vmatpush.bf16.msra.mxu0 %v3269_v23  ;;  %v2055_v55 = vadd.f32 %v2054_v37, %v2011_v28  ;;  %v2709_v37 = vor.u32 %v3180_v40, %v2706_v38  ;;  %v983_v40 = vld [vmem:[#allocation3 + $0x88] sm:$0x7f] }
 0x1a8   :  { %2350 = vmatpush.bf16.msra.mxu1 %v3280_v7 }
 0x1a9   :  { %v3959_v51 = vpop.f32.mrf.mxu2 }
 0x1ac   :  { %2351 = vmatpush.bf16.msra.mxu1 %v3279_v5  ;;  %v2776_v5 = vld [vmem:[#allocation4 + $0x138] sm:$0xf] }
 0x1ad   :  { %v3954_v50 = vpop.f32.mrf.mxu1 }
 0x1b1   :  { %2040 = vmatmul.bf16.gmra.mxu1 %v1498_v6  ;;  %v2732_v6 = vld [vmem:[#allocation4 + $0xe8] sm:$0xf] }
 0x1b2   :  { %2083 = vmatmul.bf16.gmra.mxu2 %v1499_v13  ;;  %v2734_v13 = vld [vmem:[#allocation4 + $0x10c] sm:$0xf0]  ;;  %v2733_v33 = vor.u32 %v3192_v10, %v2732_v6  ;;  %v3202_v6 = vld [vmem:[#allocation4 + $0x158] sm:$0xf0] }
 0x1b3   :  { %2121 = vmatmul.bf16.gmra.mxu3 %v2797_v22  ;;  %v2737_v8 = vor.u32 %v3188_v49, %v2734_v13  ;;  %v3198_v49 = vld [vmem:[#allocation4 + $0x13c] sm:$0xf]  ;;  %v2778_v13 = vld [vmem:[#allocation4 + $0x15c] sm:$0xf0] }
 0x1b4   :  { %2164 = vmatmul.bf16.gmra.mxu0 %v2801_v18  ;;  %v2704_v18 = vld [vmem:[#allocation4 + $0xa8] sm:$0xf]  ;;  %v2781_v38 = vor.u32 %v3198_v49, %v2778_v13 }
 0x1b5   :  { %v2705_v28 = vor.u32 %v3184_v24, %v2704_v18  ;;  %v2777_v18 = vor.u32 %v3202_v6, %v2776_v5  ;;  %v942_v24 = vld [vmem:[#allocation3 + $0x87] sm:$0x7f]  ;;  %v3167_v5 = vld [vmem:[#allocation4 + $0x40] sm:$0xf0] }
 0x1c1   :  { %2182 = vmatmul.bf16.vlgmr.msrb.gmra.mxu1 %v2625_v0  ;;  %v3278_v0 = vld [vmem:[%s4127_s4 + $0x208] sm:$0xff] }
 0x1c2   :  { %2225 = vmatmul.bf16.vlgmr.msrb.gmra.mxu2 %v2629_v2  ;;  %2352 = vmatpush.bf16.msra.mxu1 %v3278_v0 }
 0x1c3   :  { %2126 = vmatmul.bf16.gmra.mxu3 %v1500_v39  ;;  %v2768_v39 = vld [vmem:[#allocation4 + $0x130] sm:$0xf] }
 0x1c4   :  { %2169 = vmatmul.bf16.gmra.mxu0 %v1501_v12  ;;  %v3201_v12 = vld [vmem:[#allocation4 + $0x150] sm:$0xf0] }
 0x1c5   :  { %v2769_v47 = vor.u32 %v3201_v12, %v2768_v39 }
 0x1c6   :  { %2353 = vmatpush.bf16.msra.mxu1 %v3277_v52  ;;  %v2814_v52 = vld [vmem:[#allocation4 + $0x1a4] sm:$0xf0] }
 0x1d1   :  { %2187 = vmatmul.bf16.gmra.mxu1 %v2661_v11  ;;  %v3193_v11 = vld [vmem:[#allocation4 + $0x110] sm:$0xf0] }
 0x1d2   :  { %2230 = vmatmul.bf16.gmra.mxu2 %v2665_v27  ;;  %v3189_v27 = vld [vmem:[#allocation4 + $0xf4] sm:$0xf]  ;;  %v2741_v9 = vor.u32 %v3193_v11, %v2740_v61 }
 0x1d3   :  { %2268 = vmatmul.bf16.vlgmr.msrb.gmra.mxu3 %v2633_v29  ;;  %v2742_v29 = vld [vmem:[#allocation4 + $0x114] sm:$0xf0] }
 0x1d4   :  { %2311 = vmatmul.bf16.vlgmr.msra.gmra.mxu0 %v2637_v48  ;;  %v2773_v48 = vor.u32 %v3197_v43, %v2770_v17  ;;  %v2745_v15 = vor.u32 %v3189_v27, %v2742_v29  ;;  %v2812_v27 = vld [vmem:[#allocation4 + $0x180] sm:$0xf]  ;;  %v3211_v29 = vld [vmem:[#allocation4 + $0x1a0] sm:$0xf0] }
 0x1de   :  { %v2016_v54 = vpop.f32.mrf.mxu1 }
 0x1e1   :  { %v3961_v57 = vpop.f32.mrf.mxu0  ;;  %2192 = vmatmul.bf16.gmra.mxu1 %v2697_v44 }
 0x1e2   :  { %2235 = vmatmul.bf16.gmra.mxu2 %v2701_v26  ;;  %v3210_v26 = vld [vmem:[#allocation4 + $0x198] sm:$0xf0] }
 0x1e3   :  { %2273 = vmatmul.bf16.gmra.mxu3 %v2669_v58 }
 0x1e4   :  { %2316 = vmatmul.bf16.gmra.mxu0 %v2673_v59  ;;  %v3206_v59 = vld [vmem:[#allocation4 + $0x17c] sm:$0xf] }
 0x1e5   :  { %v2059_v60 = vpop.f32.mrf.mxu2 }
 0x1e6   :  { %v2060_v62 = vadd.f32 %v2059_v60, %v2016_v54  ;;  %v2097_v1 = vpop.f32.mrf.mxu3  ;;  %v2018_v3 = vpop.f32.mrf.mxu1  ;;  %v2806_v60 = vld [vmem:[#allocation4 + $0x19c] sm:$0xf0] }
 0x1e7   :  { %v3963_v4 = vadd.f32 %v2097_v1, %v2055_v55 }
 0x1e9   :  { %v3965_v41 = vpop.f32.mrf.mxu0 }
 0x1ed   :  { %v2061_v34 = vpop.f32.mrf.mxu2 }
 0x1ee   :  { %v2062_v14 = vadd.f32 %v2061_v34, %v2018_v3  ;;  %v3970_v22 = vpop.f32.mrf.mxu3  ;;  %v2021_v23 = vpop.f32.mrf.mxu1  ;;  %v2805_v34 = vor.u32 %v3210_v26, %v2804_v25 }
 0x1f1   :  { %v3972_v35 = vpop.f32.mrf.mxu0  ;;  %2197 = vmatmul.bf16.gmra.mxu1 %v2733_v33  ;;  %v968_v33 = vld [vmem:[#allocation4 + $0x1c8] sm:$0xf] }
 0x1f2   :  { %2240 = vmatmul.bf16.gmra.mxu2 %v2737_v8  ;;  %v955_v8 = vpack.c.bf16 %v942_v24, %v942_v24 }
 0x1f3   :  { %2278 = vmatmul.bf16.gmra.mxu3 %v2705_v28  ;;  %v996_v28 = vpack.c.bf16 %v983_v40, %v983_v40 }
 0x1f4   :  { %2321 = vmatmul.bf16.gmra.mxu0 %v2709_v37  ;;  %v1009_v37 = vld [vmem:[#allocation4 + $0x1cc] sm:$0xf] }
 0x1f5   :  { %v2064_v30 = vpop.f32.mrf.mxu2 }
 0x1f6   :  { %v2065_v31 = vadd.f32 %v2064_v30, %v2021_v23  ;;  %v2102_v32 = vpop.f32.mrf.mxu3  ;;  %v2023_v55 = vpop.f32.mrf.mxu1  ;;  %v969_v30 = vsel %vm3781_vm7, %v955_v8, %v968_v33 }
 0x1f7   :  { %v3974_v36 = vadd.f32 %v2102_v32, %v2060_v62  ;;  %970 = vst [vmem:[#allocation4 + $0x1c8] sm:$0xf] %v969_v30 }
 0x1f9   :  { %v3979_v2 = vpop.f32.mrf.mxu0 }
 0x1fd   :  { %v2066_v19 = vpop.f32.mrf.mxu2 }
 0x1fe   :  { %v2067_v16 = vadd.f32 %v2066_v19, %v2023_v55  ;;  %v2104_v21 = vpop.f32.mrf.mxu3  ;;  %v2026_v20 = vpop.f32.mrf.mxu1  ;;  %v1115_v19 = vld [vmem:[#allocation4 + $0x1c0] sm:$0xff] }
 0x1ff   :  { %v3981_v63 = vadd.f32 %v2104_v21, %v2062_v14  ;;  %v2809_v14 = vor.u32 %v3206_v59, %v2806_v60  ;;  %v1439_v17 = vunpack.c.l.b16 %v1115_v19 }
 0x201   :  { %v3983_v7 = vpop.f32.mrf.mxu0  ;;  %2202 = vmatmul.bf16.gmra.mxu1 %v2769_v47 }
 0x202   :  { %2245 = vmatmul.bf16.gmra.mxu2 %v2773_v48 }
 0x203   :  { %2283 = vmatmul.bf16.gmra.mxu3 %v2741_v9  ;;  %v1502_v9 = vpack.c.b16 %v1439_v17, %v1439_v17 }
 0x204   :  { %2326 = vmatmul.bf16.gmra.mxu0 %v2745_v15  ;;  %v3207_v15 = vld [vmem:[#allocation4 + $0x184] sm:$0xf] }
 0x205   :  { %v2069_v53 = vpop.f32.mrf.mxu2 }
 0x206   :  { %v2070_v54 = vadd.f32 %v2069_v53, %v2026_v20  ;;  %v2107_v56 = vpop.f32.mrf.mxu3  ;;  %v2028_v42 = vpop.f32.mrf.mxu1  ;;  %v2141_v20 = vadd.f32 %v3961_v57, %v3963_v4  ;;  %v2817_v57 = vor.u32 %v3207_v15, %v2814_v52  ;;  %v2712_v52 = vld [vmem:[#allocation4 + $0xb0] sm:$0xf] }
 0x207   :  { %v3988_v44 = vadd.f32 %v2107_v56, %v2065_v31  ;;  %v1010_v31 = vsel %vm3781_vm7, %v996_v28, %v1009_v37 }
 0x208   :  { %1011 = vst [vmem:[#allocation4 + $0x1cc] sm:$0xf] %v1010_v31  ;;  %v2148_v31 = vadd.f32 %v3979_v2, %v3981_v63 }
 0x209   :  { %v3990_v46 = vpop.f32.mrf.mxu0 }
 0x20d   :  { %v2071_v58 = vpop.f32.mrf.mxu2 }
 0x20e   :  { %v2072_v62 = vadd.f32 %v2071_v58, %v2028_v42  ;;  %v2109_v1 = vpop.f32.mrf.mxu3  ;;  %v2031_v3 = vpop.f32.mrf.mxu1  ;;  %v2813_v42 = vor.u32 %v3211_v29, %v2812_v27 }
 0x20f   :  { %v3992_v10 = vadd.f32 %v2109_v1, %v2067_v16  ;;  %v1440_v16 = vunpack.c.h.b16 %v1115_v19  ;;  %v1116_v1 = vld [vmem:[#allocation4 + $0x1c8] sm:$0xff] }
 0x210   :  { %v1442_v6 = vunpack.c.h.b16 %v1116_v1 }
 0x211   :  { %v3994_v23 = vpop.f32.mrf.mxu0  ;;  %2207 = vmatmul.bf16.gmra.mxu1 %v2805_v34  ;;  %v1503_v53 = vpack.c.b16 %v1440_v16, %v1440_v16 }
 0x212   :  { %2250 = vmatmul.bf16.gmra.mxu2 %v2809_v14  ;;  %v2146_v14 = vadd.f32 %v3972_v35, %v3974_v36  ;;  %v1505_v40 = vpack.c.b16 %v1442_v6, %v1442_v6  ;;  %v2676_v36 = vld [vmem:[#allocation4 + $0x68] sm:$0xf] }
 0x213   :  { %2288 = vmatmul.bf16.gmra.mxu3 %v2777_v18 }
 0x214   :  { %2331 = vmatmul.bf16.gmra.mxu0 %v2781_v38 }
 0x215   :  { %v2074_v32 = vpop.f32.mrf.mxu2 }
 0x216   :  { %v2075_v55 = vadd.f32 %v2074_v32, %v2031_v3  ;;  %v2112_v0 = vpop.f32.mrf.mxu3  ;;  %v2033_v39 = vpop.f32.mrf.mxu1  ;;  %v2640_v3 = vld [vmem:[#allocation4 + $0x20] sm:$0xf]  ;;  %v3176_v32 = vld [vmem:[#allocation4 + $0x88] sm:$0xf0] }
 0x217   :  { %v4000_v12 = vadd.f32 %v2112_v0, %v2070_v54  ;;  %v2057_v54 = vadd.f32 %v3959_v51, %v3954_v50  ;;  %v1441_v51 = vunpack.c.l.b16 %v1116_v1  ;;  %v2641_v33 = vor.u32 %v3167_v5, %v2640_v3  ;;  %v2748_v3 = vld [vmem:[#allocation4 + $0xf8] sm:$0xf]  ;;  %v3194_v5 = vld [vmem:[#allocation4 + $0x118] sm:$0xf0] }
 0x218   :  { %v2677_v16 = vor.u32 %v3176_v32, %v2676_v36  ;;  %v3203_v36 = vld [vmem:[#allocation4 + $0x160] sm:$0xf0] }
 0x219   :  { %v4002_v43 = vpop.f32.mrf.mxu0  ;;  %v2100_v4 = vadd.f32 %v3970_v22, %v2057_v54  ;;  %v1504_v24 = vpack.c.b16 %v1441_v51, %v1441_v51 }
 0x21d   :  { %v2076_v21 = vpop.f32.mrf.mxu2 }
 0x21e   :  { %v2077_v61 = vadd.f32 %v2076_v21, %v2033_v39  ;;  %v2114_v11 = vpop.f32.mrf.mxu3  ;;  %v2036_v47 = vpop.f32.mrf.mxu1  ;;  %v2151_v21 = vadd.f32 %v3983_v7, %v3988_v44 }
 0x21f   :  { %v4006_v48 = vadd.f32 %v2114_v11, %v2072_v62  ;;  %v2143_v62 = vadd.f32 %v3965_v41, %v2100_v4  ;;  %v2156_v4 = vadd.f32 %v3994_v23, %v4000_v12 }
 0x221   :  { %v4010_v56 = vpop.f32.mrf.mxu0  ;;  %2212 = vmatmul.bf16.gmra.mxu1 %v1502_v9  ;;  %v2153_v9 = vadd.f32 %v3990_v46, %v3992_v10  ;;  %v2158_v1 = vadd.f32 %v4002_v43, %v4006_v48 }
 0x222   :  { %2255 = vmatmul.bf16.gmra.mxu2 %v1503_v53 }
 0x223   :  { %2293 = vmatmul.bf16.gmra.mxu3 %v2813_v42 }
 0x224   :  { %2336 = vmatmul.bf16.gmra.mxu0 %v2817_v57 }
 0x225   :  { %v2079_v25 = vpop.f32.mrf.mxu2 }
 0x226   :  { %v2080_v26 = vadd.f32 %v2079_v25, %v2036_v47  ;;  %v2117_v58 = vpop.f32.mrf.mxu3  ;;  %v2038_v59 = vpop.f32.mrf.mxu1 }
 0x227   :  { %v4013_v60 = vadd.f32 %v2117_v58, %v2075_v55 }
 0x229   :  { %v4016_v50 = vpop.f32.mrf.mxu0 }
 0x22d   :  { %v2081_v34 = vpop.f32.mrf.mxu2 }
 0x22e   :  { %v2082_v49 = vadd.f32 %v2081_v34, %v2038_v59  ;;  %v2119_v22 = vpop.f32.mrf.mxu3  ;;  %v2041_v13 = vpop.f32.mrf.mxu1 }
 0x22f   :  { %v4020_v18 = vadd.f32 %v2119_v22, %v2077_v61 }
 0x231   :  { %v4022_v41 = vpop.f32.mrf.mxu0  ;;  %2354 = vmatmul.bf16.vlgmr.msra.gmra.mxu1 %v2641_v33 }
 0x233   :  { %2298 = vmatmul.bf16.gmra.mxu3 %v1504_v24 }
 0x234   :  { %2341 = vmatmul.bf16.gmra.mxu0 %v1505_v40 }
 0x235   :  { %v2084_v38 = vpop.f32.mrf.mxu2 }
 0x236   :  { %v2085_v8 = vadd.f32 %v2084_v38, %v2041_v13  ;;  %v2122_v28 = vpop.f32.mrf.mxu3  ;;  %v2043_v37 = vpop.f32.mrf.mxu1  ;;  %v2749_v13 = vor.u32 %v3194_v5, %v2748_v3 }
 0x237   :  { %v4024_v30 = vadd.f32 %v2122_v28, %v2080_v26  ;;  %v2163_v28 = vadd.f32 %v4016_v50, %v4020_v18  ;;  %v1050_v50 = vld [vmem:[#allocation4 + $0x1d0] sm:$0xf] }
 0x239   :  { %v4028_v35 = vpop.f32.mrf.mxu0 }
 0x23d   :  { %v2086_v55 = vpop.f32.mrf.mxu2 }
 0x23e   :  { %v2124_v0 = vpop.f32.mrf.mxu3  ;;  %v2183_v39 = vpop.f32.mrf.mxu1 }
 0x23f   :  { %v4030_v19 = vadd.f32 %v2124_v0, %v2082_v49  ;;  %v2184_v17 = vadd.f32 %v2183_v39, %v2141_v20  ;;  %v3185_v20 = vld [vmem:[#allocation4 + $0xd0] sm:$0xf0] }
 0x240   :  { %v2713_v57 = vor.u32 %v3185_v20, %v2712_v52 }
 0x241   :  { %v4034_v61 = vpop.f32.mrf.mxu0  ;;  %2359 = vmatmul.bf16.gmra.mxu1 %v2677_v16  ;;  %v2166_v16 = vadd.f32 %v4022_v41, %v4024_v30  ;;  %v2168_v20 = vadd.f32 %v4028_v35, %v4030_v19  ;;  %v2820_v30 = vld [vmem:[#allocation4 + $0x188] sm:$0xf] }
 0x245   :  { %v2226_v11 = vpop.f32.mrf.mxu2 }
 0x246   :  { %v2127_v47 = vpop.f32.mrf.mxu3  ;;  %v2227_v2 = vadd.f32 %v2226_v11, %v2184_v17  ;;  %v2185_v63 = vpop.f32.mrf.mxu1  ;;  %v1024_v11 = vld [vmem:[#allocation3 + $0x89] sm:$0x7f] }
 0x247   :  { %v4036_v27 = vadd.f32 %v2127_v47, %v2085_v8  ;;  %v2186_v29 = vadd.f32 %v2185_v63, %v2143_v62  ;;  %v1037_v18 = vpack.c.bf16 %v1024_v11, %v1024_v11 }
 0x249   :  { %v2172_v15 = vpop.f32.mrf.mxu0  ;;  %v1051_v47 = vsel %vm3781_vm7, %v1037_v18, %v1050_v50 }
 0x24a   :  { %1052 = vst [vmem:[#allocation4 + $0x1d0] sm:$0xf] %v1051_v47 }
 0x24d   :  { %v2228_v53 = vpop.f32.mrf.mxu2 }
 0x24e   :  { %v2129_v54 = vpop.f32.mrf.mxu3  ;;  %v2229_v42 = vadd.f32 %v2228_v53, %v2186_v29  ;;  %v2188_v7 = vpop.f32.mrf.mxu1  ;;  %v3212_v53 = vld [vmem:[#allocation4 + $0x1a8] sm:$0xf0] }
 0x24f   :  { %v2189_v44 = vadd.f32 %v2188_v7, %v2146_v14  ;;  %v2161_v14 = vadd.f32 %v4010_v56, %v4013_v60 }
 0x251   :  { %v4042_v25 = vpop.f32.mrf.mxu0  ;;  %2364 = vmatmul.bf16.gmra.mxu1 %v2713_v57  ;;  %v1117_v19 = vld [vmem:[#allocation4 + $0x1d0] sm:$0xf] }
 0x255   :  { %v2231_v26 = vpop.f32.mrf.mxu2 }
 0x256   :  { %v2232_v58 = vadd.f32 %v2231_v26, %v2189_v44  ;;  %v2269_v59 = vpop.f32.mrf.mxu3  ;;  %v2190_v62 = vpop.f32.mrf.mxu1  ;;  %v2171_v26 = vadd.f32 %v4034_v61, %v4036_v27 }
 0x257   :  { %v4044_v46 = vadd.f32 %v2269_v59, %v2227_v2  ;;  %v2191_v10 = vadd.f32 %v2190_v62, %v2148_v31  ;;  %v2784_v31 = vld [vmem:[#allocation4 + $0x140] sm:$0xf] }
 0x258   :  { %v2785_v17 = vor.u32 %v3203_v36, %v2784_v31 }
 0x259   :  { %v4048_v51 = vpop.f32.mrf.mxu0  ;;  %v2313_v61 = vadd.f32 %v4042_v25, %v4044_v46 }
 0x25d   :  { %v2233_v6 = vpop.f32.mrf.mxu2 }
 0x25e   :  { %v2234_v34 = vadd.f32 %v2233_v6, %v2191_v10  ;;  %v2271_v23 = vpop.f32.mrf.mxu3  ;;  %v2193_v12 = vpop.f32.mrf.mxu1  ;;  %v1443_v6 = vunpack.c.l.b16 %v1117_v19 }
 0x25f   :  { %v4050_v49 = vadd.f32 %v2271_v23, %v2229_v42  ;;  %v2194_v22 = vadd.f32 %v2193_v12, %v2151_v21 }
 0x260   :  { %v1506_v23 = vpack.c.b16 %v1443_v6, %v1443_v6 }
 0x261   :  { %v4054_v24 = vpop.f32.mrf.mxu0  ;;  %2369 = vmatmul.bf16.gmra.mxu1 %v2749_v13 }
 0x265   :  { %v2236_v33 = vpop.f32.mrf.mxu2 }
 0x266   :  { %v2237_v43 = vadd.f32 %v2236_v33, %v2194_v22  ;;  %v2274_v48 = vpop.f32.mrf.mxu3  ;;  %v2195_v40 = vpop.f32.mrf.mxu1 }
 0x267   :  { %v4056_v38 = vadd.f32 %v2274_v48, %v2232_v58  ;;  %v2196_v8 = vadd.f32 %v2195_v40, %v2153_v9 }
 0x269   :  { %v4060_v37 = vpop.f32.mrf.mxu0 }
 0x26d   :  { %v2238_v32 = vpop.f32.mrf.mxu2 }
 0x26e   :  { %v2239_v55 = vadd.f32 %v2238_v32, %v2196_v8  ;;  %v2276_v56 = vpop.f32.mrf.mxu3  ;;  %v2198_v60 = vpop.f32.mrf.mxu1  ;;  %v2315_v32 = vadd.f32 %v4048_v51, %v4050_v49 }
 0x26f   :  { %v4062_v0 = vadd.f32 %v2276_v56, %v2234_v34  ;;  %v2199_v39 = vadd.f32 %v2198_v60, %v2156_v4  ;;  %v2821_v4 = vor.u32 %v3212_v53, %v2820_v30 }
 0x271   :  { %v4066_v21 = vpop.f32.mrf.mxu0  ;;  %2374 = vmatmul.bf16.gmra.mxu1 %v2785_v17  ;;  %v2320_v11 = vadd.f32 %v4060_v37, %v4062_v0 }
 0x275   :  { %v2241_v2 = vpop.f32.mrf.mxu2 }
 0x276   :  { %v2242_v63 = vadd.f32 %v2241_v2, %v2199_v39  ;;  %v2279_v29 = vpop.f32.mrf.mxu3  ;;  %v2200_v9 = vpop.f32.mrf.mxu1 }
 0x277   :  { %v2280_v15 = vadd.f32 %v2279_v29, %v2237_v43  ;;  %v2201_v52 = vadd.f32 %v2200_v9, %v2158_v1 }
 0x279   :  { %v4072_v41 = vpop.f32.mrf.mxu0  ;;  %v2323_v51 = vadd.f32 %v4066_v21, %v2280_v15 }
 0x27d   :  { %v2243_v54 = vpop.f32.mrf.mxu2 }
 0x27e   :  { %v2244_v42 = vadd.f32 %v2243_v54, %v2201_v52  ;;  %v2281_v7 = vpop.f32.mrf.mxu3  ;;  %v2203_v44 = vpop.f32.mrf.mxu1 }
 0x27f   :  { %v2282_v45 = vadd.f32 %v2281_v7, %v2239_v55  ;;  %v2204_v57 = vadd.f32 %v2203_v44, %v2161_v14  ;;  %v2318_v55 = vadd.f32 %v4054_v24, %v4056_v38 }
 0x281   :  { %v2327_v58 = vpop.f32.mrf.mxu0  ;;  %2379 = vmatmul.bf16.gmra.mxu1 %v2821_v4  ;;  %v2325_v37 = vadd.f32 %v4072_v41, %v2282_v45 }
 0x285   :  { %v2246_v59 = vpop.f32.mrf.mxu2 }
 0x286   :  { %v2247_v62 = vadd.f32 %v2246_v59, %v2204_v57  ;;  %v2284_v10 = vpop.f32.mrf.mxu3  ;;  %v2205_v35 = vpop.f32.mrf.mxu1 }
 0x287   :  { %v2285_v1 = vadd.f32 %v2284_v10, %v2242_v63  ;;  %v2206_v3 = vadd.f32 %v2205_v35, %v2163_v28 }
 0x289   :  { %v2329_v5 = vpop.f32.mrf.mxu0  ;;  %v2328_v21 = vadd.f32 %v2327_v58, %v2285_v1 }
 0x28d   :  { %v2248_v34 = vpop.f32.mrf.mxu2 }
 0x28e   :  { %v2249_v12 = vadd.f32 %v2248_v34, %v2206_v3  ;;  %v2286_v22 = vpop.f32.mrf.mxu3  ;;  %v2208_v13 = vpop.f32.mrf.mxu1 }
 0x28f   :  { %v2287_v14 = vadd.f32 %v2286_v22, %v2244_v42  ;;  %v2209_v33 = vadd.f32 %v2208_v13, %v2166_v16 }
 0x291   :  { %v2332_v27 = vpop.f32.mrf.mxu0  ;;  %2384 = vmatmul.bf16.gmra.mxu1 %v1506_v23  ;;  %v2330_v4 = vadd.f32 %v2329_v5, %v2287_v14 }
 0x295   :  { %v2251_v43 = vpop.f32.mrf.mxu2 }
 0x296   :  { %v2252_v48 = vadd.f32 %v2251_v43, %v2209_v33  ;;  %v2289_v40 = vpop.f32.mrf.mxu3  ;;  %v2210_v8 = vpop.f32.mrf.mxu1 }
 0x297   :  { %v2290_v31 = vadd.f32 %v2289_v40, %v2247_v62  ;;  %v2211_v28 = vadd.f32 %v2210_v8, %v2168_v20 }
 0x299   :  { %v2334_v36 = vpop.f32.mrf.mxu0 }
 0x29d   :  { %v2253_v56 = vpop.f32.mrf.mxu2 }
 0x29e   :  { %v2254_v60 = vadd.f32 %v2253_v56, %v2211_v28  ;;  %v2291_v39 = vpop.f32.mrf.mxu3  ;;  %v2213_v17 = vpop.f32.mrf.mxu1 }
 0x29f   :  { %v2292_v25 = vadd.f32 %v2291_v39, %v2249_v12  ;;  %v2214_v46 = vadd.f32 %v2213_v17, %v2171_v26  ;;  %v2333_v26 = vadd.f32 %v2332_v27, %v2290_v31 }
 0x2a1   :  { %v2337_v16 = vpop.f32.mrf.mxu0  ;;  %v2335_v58 = vadd.f32 %v2334_v36, %v2292_v25 }
 0x2a5   :  { %v2256_v50 = vpop.f32.mrf.mxu2 }
 0x2a6   :  { %v2257_v18 = vadd.f32 %v2256_v50, %v2214_v46  ;;  %v2294_v47 = vpop.f32.mrf.mxu3  ;;  %v2215_v2 = vpop.f32.mrf.mxu1 }
 0x2a7   :  { %v2295_v63 = vadd.f32 %v2294_v47, %v2252_v48 }
 0x2a9   :  { %v2339_v29 = vpop.f32.mrf.mxu0  ;;  %v2338_v19 = vadd.f32 %v2337_v16, %v2295_v63 }
 0x2ad   :  { %v2258_v49 = vpop.f32.mrf.mxu2 }
 0x2ae   :  { %v2296_v24 = vpop.f32.mrf.mxu3  ;;  %v2355_v38 = vpop.f32.mrf.mxu1 }
 0x2af   :  { %v2297_v9 = vadd.f32 %v2296_v24, %v2254_v60  ;;  %v2356_v52 = vadd.f32 %v2355_v38, %v2313_v61 }
 0x2b1   :  { %2389 = vst [vmem:[%s4130_s5] sm:$0xff] %v2356_v52  ;;  %v2342_v20 = vpop.f32.mrf.mxu0  ;;  %v2340_v5 = vadd.f32 %v2339_v29, %v2297_v9 }
 0x2b6   :  { %v2299_v0 = vpop.f32.mrf.mxu3  ;;  %v2357_v30 = vpop.f32.mrf.mxu1 }
 0x2b7   :  { %v2300_v53 = vadd.f32 %v2299_v0, %v2257_v18  ;;  %v2358_v54 = vadd.f32 %v2357_v30, %v2315_v32 }
 0x2b9   :  { %v2343_v42 = vadd.f32 %v2342_v20, %v2300_v53  ;;  %2390 = vst [vmem:[%s4130_s5 + $0x8] sm:$0xff] %v2358_v54  ;;  %v2344_v15 = vpop.f32.mrf.mxu0 }
 0x2be   :  { %v2360_v7 = vpop.f32.mrf.mxu1  ;;  %v2301_v44 = vpop.f32.mrf.mxu3 }
 0x2bf   :  { %v2361_v57 = vadd.f32 %v2360_v7, %v2318_v55 }
 0x2c1   :  { %2391 = vst [vmem:[%s4130_s5 + $0x10] sm:$0xff] %v2361_v57 }
 0x2c6   :  { %v2362_v41 = vpop.f32.mrf.mxu1 }
 0x2c7   :  { %v2363_v45 = vadd.f32 %v2362_v41, %v2320_v11 }
 0x2c9   :  { %2392 = vst [vmem:[%s4130_s5 + $0x18] sm:$0xff] %v2363_v45 }
 0x2ce   :  { %v2365_v59 = vpop.f32.mrf.mxu1 }
 0x2cf   :  { %v2366_v62 = vadd.f32 %v2365_v59, %v2323_v51 }
 0x2d1   :  { %2393 = vst [vmem:[%s4130_s5 + $0x20] sm:$0xff] %v2366_v62 }
 0x2d6   :  { %v2367_v10 = vpop.f32.mrf.mxu1 }
 0x2d7   :  { %v2368_v35 = vadd.f32 %v2367_v10, %v2325_v37 }
 0x2d9   :  { %2394 = vst [vmem:[%s4130_s5 + $0x28] sm:$0xff] %v2368_v35 }
 0x2de   :  { %v2370_v1 = vpop.f32.mrf.mxu1 }
 0x2df   :  { %v2371_v3 = vadd.f32 %v2370_v1, %v2328_v21 }
 0x2e1   :  { %2395 = vst [vmem:[%s4130_s5 + $0x30] sm:$0xff] %v2371_v3 }
 0x2e6   :  { %v2372_v6 = vpop.f32.mrf.mxu1 }
 0x2e7   :  { %v2373_v34 = vadd.f32 %v2372_v6, %v2330_v4 }
 0x2e9   :  { %2396 = vst [vmem:[%s4130_s5 + $0x38] sm:$0xff] %v2373_v34 }
 0x2ee   :  { %v2375_v23 = vpop.f32.mrf.mxu1 }
 0x2ef   :  { %v2376_v12 = vadd.f32 %v2375_v23, %v2333_v26 }
 0x2f1   :  { %2397 = vst [vmem:[%s4130_s5 + $0x40] sm:$0xff] %v2376_v12 }
 0x2f6   :  { %v2377_v22 = vpop.f32.mrf.mxu1 }
 0x2f7   :  { %v2378_v13 = vadd.f32 %v2377_v22, %v2335_v58 }
 0x2f9   :  { %2398 = vst [vmem:[%s4130_s5 + $0x48] sm:$0xff] %v2378_v13 }
 0x2fe   :  { %v2380_v14 = vpop.f32.mrf.mxu1 }
 0x2ff   :  { %v2381_v33 = vadd.f32 %v2380_v14, %v2338_v19 }
 0x301   :  { %2399 = vst [vmem:[%s4130_s5 + $0x50] sm:$0xff] %v2381_v33 }
 0x306   :  { %v2382_v61 = vpop.f32.mrf.mxu1 }
 0x307   :  { %v2383_v27 = vadd.f32 %v2382_v61, %v2340_v5 }
 0x309   :  { %2400 = vst [vmem:[%s4130_s5 + $0x58] sm:$0xff] %v2383_v27 }
 0x30e   :  { %v2385_v43 = vpop.f32.mrf.mxu1 }
 0x30f   :  { %v2386_v48 = vadd.f32 %v2385_v43, %v2343_v42 }
 0x311   :  { %2401 = vst [vmem:[%s4130_s5 + $0x60] sm:$0x7f] %v2386_v48 }
 0x316   :  { %v2387_v40 = vpop.f32.mrf.mxu1 }

</bundles_post_ra>
